<compile_context>
chip_gen: v5e
topology: v5e:2x2
jax: 0.10.0
libtpu: 0.0.40
codegen_flags: <defaults>
</compile_context>

<pallas_src>
import functools
import math

import jax
import jax.numpy as jnp
from jax.experimental import pallas as pl
from jax.experimental.pallas import tpu as pltpu


# ---------------------------------------------------------------------------
# Tiling / compiler config
# ---------------------------------------------------------------------------
_TILE_M = 256                         # safe on v7x (64 MiB VMEM); sweep up on v5e/v6e
_VMEM_LIMIT_BYTES = 48 * 1024 * 1024  # < v7x physical 64 MiB, > v5e default 16 MiB


def _compiler_params(grid_rank):
    return pltpu.CompilerParams(
        dimension_semantics=("parallel",) * grid_rank,
        vmem_limit_bytes=_VMEM_LIMIT_BYTES,
    )


def _row_tile(m):
    return m if m <= _TILE_M else _TILE_M


def _cost(flops, bytes_accessed, transcendentals=0):
    return pl.CostEstimate(flops=int(flops),
                           transcendentals=int(transcendentals),
                           bytes_accessed=int(bytes_accessed))


# ---------------------------------------------------------------------------
# In-kernel math helpers
# ---------------------------------------------------------------------------
def _gelu_tanh(x):
    # TODO(synk): HF ViT uses exact (erf) GELU; tanh approximation kept since
    # erf has no guaranteed Mosaic lowering.  Numerics differ by <1e-3.
    c = 0.7978845608028654  # sqrt(2/pi)
    return 0.5 * x * (1.0 + jnp.tanh(c * (x + 0.044715 * x * x * x)))


def _ln(x, g, b, eps):
    mean = jnp.mean(x, axis=-1, keepdims=True)
    xc = x - mean
    var = jnp.mean(xc * xc, axis=-1, keepdims=True)
    return xc * jax.lax.rsqrt(var + eps) * g + b


# ---------------------------------------------------------------------------
# Kernel 1: patch embedding (Conv2d stride=P as matmul) + positional add
# ---------------------------------------------------------------------------
def _patch_embed_kernel(x_ref, w_ref, b_ref, pos_ref, o_ref):
    y = jnp.dot(x_ref[0].astype(jnp.bfloat16), w_ref[...],
                preferred_element_type=jnp.float32)
    o_ref[0] = (y + b_ref[...] + pos_ref[0]).astype(o_ref.dtype)


def patch_embed(x, w, b, pos_patch):
    """x: (B, N, CPP) f32, w: (CPP, D) bf16, b: (1, D), pos: (1, N, D) -> (B, N, D) bf16."""
    B, N, CPP = x.shape
    D = w.shape[1]
    tn = _row_tile(N)
    return pl.pallas_call(
        _patch_embed_kernel,
        out_shape=jax.ShapeDtypeStruct((B, N, D), jnp.bfloat16),
        grid=(B, pl.cdiv(N, tn)),
        in_specs=[
            pl.BlockSpec((1, tn, CPP), lambda bi, j: (bi, j, 0)),
            pl.BlockSpec((CPP, D), lambda bi, j: (0, 0)),
            pl.BlockSpec((1, D), lambda bi, j: (0, 0)),
            pl.BlockSpec((1, tn, D), lambda bi, j: (0, j, 0)),
        ],
        out_specs=pl.BlockSpec((1, tn, D), lambda bi, j: (bi, j, 0)),
        compiler_params=_compiler_params(2),
        cost_estimate=_cost(
            flops=2 * B * N * CPP * D,
            bytes_accessed=B * N * CPP * 4 + CPP * D * 2 + B * N * D * 6 + D * 4,
        ),
    )(x, w, b, pos_patch)


# ---------------------------------------------------------------------------
# Kernel 2: LayerNorm1 + fused QKV projection  (bf16 in, bf16 out, f32 acc)
# ---------------------------------------------------------------------------
def _ln_qkv_kernel(x_ref, g_ref, b_ref, w_ref, bias_ref, o_ref, *, eps):
    xn = _ln(x_ref[...].astype(jnp.float32), g_ref[...], b_ref[...], eps)
    y = jnp.dot(xn.astype(jnp.bfloat16), w_ref[...],
                preferred_element_type=jnp.float32)
    o_ref[...] = (y + bias_ref[...]).astype(o_ref.dtype)


def ln_qkv(x, g, b, w, bias):
    """x: (M, D) bf16, w: (D, 3D) bf16 -> (M, 3D) bf16."""
    M, D = x.shape
    N3 = w.shape[1]
    tm = _row_tile(M)
    return pl.pallas_call(
        functools.partial(_ln_qkv_kernel, eps=1e-12),
        out_shape=jax.ShapeDtypeStruct((M, N3), jnp.bfloat16),
        grid=(pl.cdiv(M, tm),),
        in_specs=[
            pl.BlockSpec((tm, D), lambda i: (i, 0)),
            pl.BlockSpec((1, D), lambda i: (0, 0)),
            pl.BlockSpec((1, D), lambda i: (0, 0)),
            pl.BlockSpec((D, N3), lambda i: (0, 0)),
            pl.BlockSpec((1, N3), lambda i: (0, 0)),
        ],
        out_specs=pl.BlockSpec((tm, N3), lambda i: (i, 0)),
        compiler_params=_compiler_params(1),
        cost_estimate=_cost(
            flops=2 * M * D * N3,
            bytes_accessed=M * D * 2 + D * N3 * 2 + M * N3 * 2 + 3 * D * 4 + N3 * 4,
            transcendentals=M,
        ),
    )(x, g, b, w, bias)


# ---------------------------------------------------------------------------
# Kernel 3: multi-head attention + fused out-projection + bias + residual.
#   Per-head context is accumulated into an f32 VMEM scratch as ctx_h @ wo_h,
#   so there is no lane concatenate and only one lane-dense (S, D) store.
#   The softmax scale is pre-folded into the Q projection weights.
# ---------------------------------------------------------------------------
def _attention_kernel(qkv_ref, wo_ref, bo_ref, res_ref, o_ref, acc_ref, *,
                      n_heads, head_dim):
    D = n_heads * head_dim
    for h in range(n_heads):                      # static loop, static slices
        q = qkv_ref[0, :, h * head_dim:(h + 1) * head_dim]
        k = qkv_ref[0, :, D + h * head_dim:D + (h + 1) * head_dim]
        v = qkv_ref[0, :, 2 * D + h * head_dim:2 * D + (h + 1) * head_dim]
        # q @ k^T without materializing a transpose (scale folded into wqkv)
        s = jax.lax.dot_general(q, k, (((1,), (1,)), ((), ())),
                                preferred_element_type=jnp.float32)
        s = s - jnp.max(s, axis=-1, keepdims=True)
        e = jnp.exp(s)
        p = e / jnp.sum(e, axis=-1, keepdims=True)      # exact softmax
        ctx = jnp.dot(p.astype(jnp.bfloat16), v,
                      preferred_element_type=jnp.float32)          # (S, Dh)
        contrib = jnp.dot(ctx.astype(jnp.bfloat16),
                          wo_ref[h * head_dim:(h + 1) * head_dim, :],
                          preferred_element_type=jnp.float32)      # (S, D)
        if h == 0:
            acc_ref[...] = contrib
        else:
            acc_ref[...] += contrib
    o_ref[0] = (acc_ref[...] + bo_ref[...] +
                res_ref[0].astype(jnp.float32)).astype(o_ref.dtype)


def attention(qkv, resid, wo, bo, n_heads, head_dim):
    """qkv: (B, S, 3D) bf16, resid: (B, S, D) bf16, wo: (D, D) bf16 -> (B, S, D) bf16."""
    B, S, D3 = qkv.shape
    D = D3 // 3
    return pl.pallas_call(
        functools.partial(_attention_kernel, n_heads=n_heads,
                          head_dim=head_dim),
        out_shape=jax.ShapeDtypeStruct((B, S, D), jnp.bfloat16),
        grid=(B,),
        in_specs=[
            pl.BlockSpec((1, S, D3), lambda bi: (bi, 0, 0)),
            pl.BlockSpec((D, D), lambda bi: (0, 0)),
            pl.BlockSpec((1, D), lambda bi: (0, 0)),
            pl.BlockSpec((1, S, D), lambda bi: (bi, 0, 0)),
        ],
        out_specs=pl.BlockSpec((1, S, D), lambda bi: (bi, 0, 0)),
        scratch_shapes=[pltpu.VMEM((S, D), jnp.float32)],
        compiler_params=_compiler_params(1),
        cost_estimate=_cost(
            flops=B * (4 * S * S * D + 2 * S * D * D),
            bytes_accessed=B * (S * D3 * 2 + D * D * 2 + D * 4 + 2 * S * D * 2),
            transcendentals=B * n_heads * S * S,
        ),
    )(qkv, wo, bo, resid)


# ---------------------------------------------------------------------------
# Kernel 4: fused MLP block: LN2 -> W1+bias -> GELU -> W2+bias -> +residual
# ---------------------------------------------------------------------------
def _mlp_block_kernel(x_ref, g_ref, b_ref, w1_ref, b1_ref, w2_ref, b2_ref,
                      o_ref, *, eps):
    x = x_ref[...].astype(jnp.float32)
    xn = _ln(x, g_ref[...], b_ref[...], eps)
    h1 = jnp.dot(xn.astype(jnp.bfloat16), w1_ref[...],
                 preferred_element_type=jnp.float32) + b1_ref[...]
    h1 = _gelu_tanh(h1)
    h2 = jnp.dot(h1.astype(jnp.bfloat16), w2_ref[...],
                 preferred_element_type=jnp.float32) + b2_ref[...]
    o_ref[...] = (h2 + x).astype(o_ref.dtype)   # residual = pre-LN input


def mlp_block(x, g, b, w1, b1, w2, b2):
    """x: (M, D) bf16, w1: (D, H) bf16, w2: (H, D) bf16 -> (M, D) bf16."""
    M, D = x.shape
    H = w1.shape[1]
    tm = _row_tile(M)
    return pl.pallas_call(
        functools.partial(_mlp_block_kernel, eps=1e-12),
        out_shape=jax.ShapeDtypeStruct((M, D), jnp.bfloat16),
        grid=(pl.cdiv(M, tm),),
        in_specs=[
            pl.BlockSpec((tm, D), lambda i: (i, 0)),
            pl.BlockSpec((1, D), lambda i: (0, 0)),
            pl.BlockSpec((1, D), lambda i: (0, 0)),
            pl.BlockSpec((D, H), lambda i: (0, 0)),
            pl.BlockSpec((1, H), lambda i: (0, 0)),
            pl.BlockSpec((H, D), lambda i: (0, 0)),
            pl.BlockSpec((1, D), lambda i: (0, 0)),
        ],
        out_specs=pl.BlockSpec((tm, D), lambda i: (i, 0)),
        compiler_params=_compiler_params(1),
        cost_estimate=_cost(
            flops=4 * M * D * H,
            bytes_accessed=2 * M * D * 2 + 2 * D * H * 2 + (3 * D + H) * 4,
            transcendentals=M * H,
        ),
    )(x, g, b, w1, b1, w2, b2)


# ---------------------------------------------------------------------------
# Kernel 5: final LayerNorm (bf16 in, f32 out)
# ---------------------------------------------------------------------------
def _layernorm_kernel(x_ref, g_ref, b_ref, o_ref, *, eps):
    o_ref[...] = _ln(x_ref[...].astype(jnp.float32),
                     g_ref[...], b_ref[...], eps).astype(o_ref.dtype)


def layernorm(x, g, b, eps=1e-12):
    M, D = x.shape
    tm = _row_tile(M)
    return pl.pallas_call(
        functools.partial(_layernorm_kernel, eps=eps),
        out_shape=jax.ShapeDtypeStruct((M, D), jnp.float32),
        grid=(pl.cdiv(M, tm),),
        in_specs=[
            pl.BlockSpec((tm, D), lambda i: (i, 0)),
            pl.BlockSpec((1, D), lambda i: (0, 0)),
            pl.BlockSpec((1, D), lambda i: (0, 0)),
        ],
        out_specs=pl.BlockSpec((tm, D), lambda i: (i, 0)),
        compiler_params=_compiler_params(1),
        cost_estimate=_cost(
            flops=10 * M * D,
            bytes_accessed=M * D * 2 + M * D * 4 + 2 * D * 4,
            transcendentals=M,
        ),
    )(x, g, b)


# ---------------------------------------------------------------------------
# Synthetic deterministic ViT parameters
#   * QKV fused at init into a single (D, 3D) bf16 weight.
#   * Attention scale 1/sqrt(head_dim) folded into the Q columns.
#   * All matmul weights pre-cast to bf16 (biases / LN params stay f32).
# ---------------------------------------------------------------------------
def init_params(key, cfg):
    D, C, P = cfg["hidden"], cfg["channels"], cfg["patch"]
    MLP, L, S = cfg["mlp"], cfg["layers"], cfg["seq"]
    Dh = D // cfg["heads"]
    patch_dim = C * P * P
    std = 0.02

    def nrm(k, shape):
        return jax.random.normal(k, shape, dtype=jnp.float32) * std

    keys = jax.random.split(key, 4 + L)
    params = {
        "patch_w": nrm(keys[0], (patch_dim, D)).astype(jnp.bfloat16),
        "patch_b": jnp.zeros((1, D), jnp.float32),
        "cls": nrm(keys[1], (1, 1, D)),
        "pos": nrm(keys[2], (1, S, D)),
        "lnf_g": jnp.ones((1, D), jnp.float32),
        "lnf_b": jnp.zeros((1, D), jnp.float32),
        "layers": [],
    }
    scale = 1.0 / math.sqrt(Dh)
    for li in range(L):
        lk = jax.random.split(keys[4 + li], 6)
        wq, wk, wv = nrm(lk[0], (D, D)), nrm(lk[1], (D, D)), nrm(lk[2], (D, D))
        bq = jnp.zeros((D,), jnp.float32)
        bk = jnp.zeros((D,), jnp.float32)
        bv = jnp.zeros((D,), jnp.float32)
        # fold the 1/sqrt(head_dim) softmax scale into the Q projection
        wqkv = jnp.concatenate([wq * scale, wk, wv], axis=1).astype(jnp.bfloat16)
        bqkv = jnp.concatenate([bq * scale, bk, bv])[None, :]
        params["layers"].append({
            "ln1_g": jnp.ones((1, D), jnp.float32),
            "ln1_b": jnp.zeros((1, D), jnp.float32),
            "wqkv": wqkv, "bqkv": bqkv,
            "wo": nrm(lk[3], (D, D)).astype(jnp.bfloat16),
            "bo": jnp.zeros((1, D), jnp.float32),
            "ln2_g": jnp.ones((1, D), jnp.float32),
            "ln2_b": jnp.zeros((1, D), jnp.float32),
            "w1": nrm(lk[4], (D, MLP)).astype(jnp.bfloat16),
            "b1": jnp.zeros((1, MLP), jnp.float32),
            "w2": nrm(lk[5], (MLP, D)).astype(jnp.bfloat16),
            "b2": jnp.zeros((1, D), jnp.float32),
        })
    return params


# ---------------------------------------------------------------------------
# ViT forward == ImageEncoder.forward (returns last_hidden_state)
# ---------------------------------------------------------------------------
def image_encoder_forward(params, images, cfg):
    B, C, Himg, Wimg = images.shape
    P, D, nH = cfg["patch"], cfg["hidden"], cfg["heads"]
    Dh = D // nH
    nph, npw = Himg // P, Wimg // P
    N = nph * npw
    S = N + 1

    # -- patch extraction (pure layout, no compute) ---------------------------
    x = images.reshape(B, C, nph, P, npw, P)
    x = x.transpose(0, 2, 4, 1, 3, 5).reshape(B, N, C * P * P)

    # -- patch embedding + positional embedding (fused kernel, bf16 out) -----
    pos_patch = params["pos"][:, 1:, :]                       # (1, N, D)
    patch_emb = patch_embed(x, params["patch_w"], params["patch_b"], pos_patch)

    cls = jnp.broadcast_to(
        (params["cls"] + params["pos"][:, :1, :]).astype(jnp.bfloat16), (B, 1, D))
    h = jnp.concatenate([cls, patch_emb], axis=1)             # (B, S, D) bf16
    h2d = h.reshape(B * S, D)

    # -- transformer encoder layers (pre-LN, HF ViTLayer semantics) ----------
    # TODO(synk): cross-pallas_call weight prefetch (DMA futures) would hide
    # next-layer weight HBM latency behind the current layer's compute.
    for layer in params["layers"]:
        # LN1 + fused QKV projection (bf16 intermediate)
        qkv = ln_qkv(h2d, layer["ln1_g"], layer["ln1_b"],
                     layer["wqkv"], layer["bqkv"])            # (B*S, 3D) bf16
        # attention + out-projection + bias + residual, all fused
        ctx = attention(qkv.reshape(B, S, 3 * D), h2d.reshape(B, S, D),
                        layer["wo"], layer["bo"], nH, Dh)     # (B, S, D) bf16
        h2d = ctx.reshape(B * S, D)
        # LN2 + MLP (both matmuls) + GELU + residual (fused)
        h2d = mlp_block(h2d, layer["ln2_g"], layer["ln2_b"],
                        layer["w1"], layer["b1"], layer["w2"], layer["b2"])

    out = layernorm(h2d, params["lnf_g"], params["lnf_b"])    # f32
    return out.reshape(B, S, D)  # last_hidden_state


# ---------------------------------------------------------------------------
if __name__ == "__main__":
    cfg = {
        "channels": 3,
        "patch": 8,
        "image": 16,
        "hidden": 32,
        "heads": 4,
        "mlp": 64,
        "layers": 2,
    }
    n_patches = (cfg["image"] // cfg["patch"]) ** 2
    cfg["seq"] = n_patches + 1  # +1 for CLS token

    key = jax.random.PRNGKey(0)
    k_img, k_par = jax.random.split(key)

    images = jax.random.normal(
        k_img, (2, cfg["channels"], cfg["image"], cfg["image"]), dtype=jnp.float32
    )
    params = init_params(k_par, cfg)

    fwd = jax.jit(functools.partial(image_encoder_forward, cfg=cfg))
    last_hidden_state = fwd(params, images)
    jax.block_until_ready(last_hidden_state)

    assert last_hidden_state.shape == (2, cfg["seq"], cfg["hidden"])
    assert last_hidden_state.dtype == jnp.float32
    print("KERNEL_OK")
</pallas_src>

<mosaic_0001>
module attributes {stable_mosaic.version = 11 : i64} {
  func.func @_patch_embed_kernel(%arg0: i32, %arg1: i32, %arg2: memref<1x4x192xf32, #tpu.memory_space<vmem>>, %arg3: memref<192x32xbf16, #tpu.memory_space<vmem>>, %arg4: memref<1x32xf32, #tpu.memory_space<vmem>>, %arg5: memref<1x4x32xf32, #tpu.memory_space<vmem>>, %arg6: memref<1x4x32xbf16, #tpu.memory_space<vmem>>) attributes {dimension_semantics = [#tpu.dimension_semantics<parallel>, #tpu.dimension_semantics<parallel>], iteration_bounds = array<i64: 2, 1>, scalar_prefetch = 0 : i64, scratch_operands = 0 : i64, tpu.core_type = #tpu.core_type<tc>, window_params = [{transform_indices = @transform_0, window_bounds = array<i64: 1, 4, 192>}, {pipeline_mode = #tpu.pipeline_mode<synchronous>, transform_indices = @transform_1, window_bounds = array<i64: 192, 32>}, {pipeline_mode = #tpu.pipeline_mode<synchronous>, transform_indices = @transform_2, window_bounds = array<i64: 1, 32>}, {transform_indices = @transform_3, window_bounds = array<i64: 1, 4, 32>}, {transform_indices = @transform_4, window_bounds = array<i64: 1, 4, 32>}]} {
    %c0 = arith.constant 0 : index
    %c0_0 = arith.constant 0 : index
    %c0_1 = arith.constant 0 : index
    %0 = vector.load %arg2[%c0, %c0_0, %c0_1] : memref<1x4x192xf32, #tpu.memory_space<vmem>>, vector<1x4x192xf32>
    %1 = vector.shape_cast %0 : vector<1x4x192xf32> to vector<4x192xf32>
    %2 = arith.truncf %1 : vector<4x192xf32> to vector<4x192xbf16>
    %c0_2 = arith.constant 0 : index
    %c0_3 = arith.constant 0 : index
    %3 = vector.load %arg3[%c0_2, %c0_3] : memref<192x32xbf16, #tpu.memory_space<vmem>>, vector<192x32xbf16>
    %cst = arith.constant dense<0.000000e+00> : vector<4x32xf32>
    %4 = tpu.matmul %2, %3, %cst {dimension_numbers = #tpu.dot_dimension_numbers<[1], [0], [0], [1], [0, 0, 1, 1], [], []>} : vector<4x192xbf16>, vector<192x32xbf16>, vector<4x32xf32> -> vector<4x32xf32>
    %c0_4 = arith.constant 0 : index
    %c0_5 = arith.constant 0 : index
    %5 = vector.load %arg4[%c0_4, %c0_5] : memref<1x32xf32, #tpu.memory_space<vmem>>, vector<1x32xf32>
    %6 = vector.broadcast %5 : vector<1x32xf32> to vector<4x32xf32>
    %7 = arith.addf %4, %6 : vector<4x32xf32>
    %c0_6 = arith.constant 0 : index
    %c0_7 = arith.constant 0 : index
    %c0_8 = arith.constant 0 : index
    %8 = vector.load %arg5[%c0_6, %c0_7, %c0_8] : memref<1x4x32xf32, #tpu.memory_space<vmem>>, vector<1x4x32xf32>
    %9 = vector.shape_cast %8 : vector<1x4x32xf32> to vector<4x32xf32>
    %10 = arith.addf %7, %9 : vector<4x32xf32>
    %11 = arith.truncf %10 : vector<4x32xf32> to vector<4x32xbf16>
    %c0_9 = arith.constant 0 : index
    %c0_10 = arith.constant 0 : index
    %c0_11 = arith.constant 0 : index
    %12 = vector.load %arg6[%c0_9, %c0_10, %c0_11] : memref<1x4x32xbf16, #tpu.memory_space<vmem>>, vector<1x4x32xbf16>
    %13 = vector.shape_cast %12 : vector<1x4x32xbf16> to vector<4x32xbf16>
    %14 = vector.shape_cast %11 : vector<4x32xbf16> to vector<1x4x32xbf16>
    tpu.vector_store %arg6[%c0_9, %c0_10, %c0_11], %14 {strides = array<i32>} : memref<1x4x32xbf16, #tpu.memory_space<vmem>>, vector<1x4x32xbf16>,
    return
  }
  func.func @transform_0(%arg0: i32, %arg1: i32) -> (i32, i32, i32) {
    %c0_i32 = arith.constant 0 : i32
    %c0_i32_0 = arith.constant 0 : i32
    return %arg0, %arg1, %c0_i32 : i32, i32, i32
  }
  func.func @transform_1(%arg0: i32, %arg1: i32) -> (i32, i32) {
    %c0_i32 = arith.constant 0 : i32
    %c0_i32_0 = arith.constant 0 : i32
    %c0_i32_1 = arith.constant 0 : i32
    return %c0_i32, %c0_i32_0 : i32, i32
  }
  func.func @transform_2(%arg0: i32, %arg1: i32) -> (i32, i32) {
    %c0_i32 = arith.constant 0 : i32
    %c0_i32_0 = arith.constant 0 : i32
    %c0_i32_1 = arith.constant 0 : i32
    return %c0_i32, %c0_i32_0 : i32, i32
  }
  func.func @transform_3(%arg0: i32, %arg1: i32) -> (i32, i32, i32) {
    %c0_i32 = arith.constant 0 : i32
    %c0_i32_0 = arith.constant 0 : i32
    %c0_i32_1 = arith.constant 0 : i32
    return %c0_i32, %arg1, %c0_i32_0 : i32, i32, i32
  }
  func.func @transform_4(%arg0: i32, %arg1: i32) -> (i32, i32, i32) {
    %c0_i32 = arith.constant 0 : i32
    %c0_i32_0 = arith.constant 0 : i32
    return %arg0, %arg1, %c0_i32 : i32, i32, i32
  }
}

module attributes {stable_mosaic.version = 11 : i64} {
  func.func @_ln_qkv_kernel(%arg0: i32, %arg1: memref<10x32xbf16, #tpu.memory_space<vmem>>, %arg2: memref<1x32xf32, #tpu.memory_space<vmem>>, %arg3: memref<1x32xf32, #tpu.memory_space<vmem>>, %arg4: memref<32x96xbf16, #tpu.memory_space<vmem>>, %arg5: memref<1x96xf32, #tpu.memory_space<vmem>>, %arg6: memref<10x96xbf16, #tpu.memory_space<vmem>>) attributes {dimension_semantics = [#tpu.dimension_semantics<parallel>], iteration_bounds = array<i64: 1>, scalar_prefetch = 0 : i64, scratch_operands = 0 : i64, tpu.core_type = #tpu.core_type<tc>, window_params = [{transform_indices = @transform_0, window_bounds = array<i64: 10, 32>}, {pipeline_mode = #tpu.pipeline_mode<synchronous>, transform_indices = @transform_1, window_bounds = array<i64: 1, 32>}, {pipeline_mode = #tpu.pipeline_mode<synchronous>, transform_indices = @transform_2, window_bounds = array<i64: 1, 32>}, {pipeline_mode = #tpu.pipeline_mode<synchronous>, transform_indices = @transform_3, window_bounds = array<i64: 32, 96>}, {pipeline_mode = #tpu.pipeline_mode<synchronous>, transform_indices = @transform_4, window_bounds = array<i64: 1, 96>}, {transform_indices = @transform_5, window_bounds = array<i64: 10, 96>}]} {
    %c0 = arith.constant 0 : index
    %c0_0 = arith.constant 0 : index
    %0 = vector.load %arg1[%c0, %c0_0] : memref<10x32xbf16, #tpu.memory_space<vmem>>, vector<10x32xbf16>
    %1 = arith.extf %0 : vector<10x32xbf16> to vector<10x32xf32>
    %c0_1 = arith.constant 0 : index
    %c0_2 = arith.constant 0 : index
    %2 = vector.load %arg2[%c0_1, %c0_2] : memref<1x32xf32, #tpu.memory_space<vmem>>, vector<1x32xf32>
    %c0_3 = arith.constant 0 : index
    %c0_4 = arith.constant 0 : index
    %3 = vector.load %arg3[%c0_3, %c0_4] : memref<1x32xf32, #tpu.memory_space<vmem>>, vector<1x32xf32>
    %cst = arith.constant dense<0.000000e+00> : vector<10xf32>
    %4 = vector.multi_reduction <add>, %1, %cst [1] : vector<10x32xf32> to vector<10xf32>
    %5 = vector.shape_cast %4 : vector<10xf32> to vector<10x1xf32>
    %cst_5 = arith.constant 3.200000e+01 : f32
    %6 = vector.broadcast %cst_5 : f32 to vector<10x1xf32>
    %7 = arith.divf %5, %6 : vector<10x1xf32>
    %8 = vector.broadcast %7 : vector<10x1xf32> to vector<10x32xf32>
    %9 = arith.subf %1, %8 : vector<10x32xf32>
    %10 = arith.mulf %9, %9 : vector<10x32xf32>
    %cst_6 = arith.constant dense<0.000000e+00> : vector<10xf32>
    %11 = vector.multi_reduction <add>, %10, %cst_6 [1] : vector<10x32xf32> to vector<10xf32>
    %12 = vector.shape_cast %11 : vector<10xf32> to vector<10x1xf32>
    %cst_7 = arith.constant 3.200000e+01 : f32
    %13 = vector.broadcast %cst_7 : f32 to vector<10x1xf32>
    %14 = arith.divf %12, %13 : vector<10x1xf32>
    %cst_8 = arith.constant 9.99999996E-13 : f32
    %15 = vector.broadcast %cst_8 : f32 to vector<10x1xf32>
    %16 = arith.addf %14, %15 : vector<10x1xf32>
    %17 = math.rsqrt %16 : vector<10x1xf32>
    %18 = vector.broadcast %17 : vector<10x1xf32> to vector<10x32xf32>
    %19 = arith.mulf %9, %18 : vector<10x32xf32>
    %20 = vector.broadcast %2 : vector<1x32xf32> to vector<10x32xf32>
    %21 = arith.mulf %19, %20 : vector<10x32xf32>
    %22 = vector.broadcast %3 : vector<1x32xf32> to vector<10x32xf32>
    %23 = arith.addf %21, %22 : vector<10x32xf32>
    %24 = arith.truncf %23 : vector<10x32xf32> to vector<10x32xbf16>
    %c0_9 = arith.constant 0 : index
    %c0_10 = arith.constant 0 : index
    %25 = vector.load %arg4[%c0_9, %c0_10] : memref<32x96xbf16, #tpu.memory_space<vmem>>, vector<32x96xbf16>
    %cst_11 = arith.constant dense<0.000000e+00> : vector<10x96xf32>
    %26 = tpu.matmul %24, %25, %cst_11 {dimension_numbers = #tpu.dot_dimension_numbers<[1], [0], [0], [1], [0, 0, 1, 1], [], []>} : vector<10x32xbf16>, vector<32x96xbf16>, vector<10x96xf32> -> vector<10x96xf32>
    %c0_12 = arith.constant 0 : index
    %c0_13 = arith.constant 0 : index
    %27 = vector.load %arg5[%c0_12, %c0_13] : memref<1x96xf32, #tpu.memory_space<vmem>>, vector<1x96xf32>
    %28 = vector.broadcast %27 : vector<1x96xf32> to vector<10x96xf32>
    %29 = arith.addf %26, %28 : vector<10x96xf32>
    %30 = arith.truncf %29 : vector<10x96xf32> to vector<10x96xbf16>
    %c0_14 = arith.constant 0 : index
    %c0_15 = arith.constant 0 : index
    %31 = vector.load %arg6[%c0_14, %c0_15] : memref<10x96xbf16, #tpu.memory_space<vmem>>, vector<10x96xbf16>
    tpu.vector_store %arg6[%c0_14, %c0_15], %30 {strides = array<i32>} : memref<10x96xbf16, #tpu.memory_space<vmem>>, vector<10x96xbf16>,
    return
  }
  func.func @transform_0(%arg0: i32) -> (i32, i32) {
    %c0_i32 = arith.constant 0 : i32
    %c0_i32_0 = arith.constant 0 : i32
    return %arg0, %c0_i32 : i32, i32
  }
  func.func @transform_1(%arg0: i32) -> (i32, i32) {
    %c0_i32 = arith.constant 0 : i32
    %c0_i32_0 = arith.constant 0 : i32
    %c0_i32_1 = arith.constant 0 : i32
    return %c0_i32, %c0_i32_0 : i32, i32
  }
  func.func @transform_2(%arg0: i32) -> (i32, i32) {
    %c0_i32 = arith.constant 0 : i32
    %c0_i32_0 = arith.constant 0 : i32
    %c0_i32_1 = arith.constant 0 : i32
    return %c0_i32, %c0_i32_0 : i32, i32
  }
  func.func @transform_3(%arg0: i32) -> (i32, i32) {
    %c0_i32 = arith.constant 0 : i32
    %c0_i32_0 = arith.constant 0 : i32
    %c0_i32_1 = arith.constant 0 : i32
    return %c0_i32, %c0_i32_0 : i32, i32
  }
  func.func @transform_4(%arg0: i32) -> (i32, i32) {
    %c0_i32 = arith.constant 0 : i32
    %c0_i32_0 = arith.constant 0 : i32
    %c0_i32_1 = arith.constant 0 : i32
    return %c0_i32, %c0_i32_0 : i32, i32
  }
  func.func @transform_5(%arg0: i32) -> (i32, i32) {
    %c0_i32 = arith.constant 0 : i32
    %c0_i32_0 = arith.constant 0 : i32
    return %arg0, %c0_i32 : i32, i32
  }
}

module attributes {stable_mosaic.version = 11 : i64} {
  func.func @_mlp_block_kernel(%arg0: i32, %arg1: memref<10x32xbf16, #tpu.memory_space<vmem>>, %arg2: memref<1x32xf32, #tpu.memory_space<vmem>>, %arg3: memref<1x32xf32, #tpu.memory_space<vmem>>, %arg4: memref<32x64xbf16, #tpu.memory_space<vmem>>, %arg5: memref<1x64xf32, #tpu.memory_space<vmem>>, %arg6: memref<64x32xbf16, #tpu.memory_space<vmem>>, %arg7: memref<1x32xf32, #tpu.memory_space<vmem>>, %arg8: memref<10x32xbf16, #tpu.memory_space<vmem>>) attributes {dimension_semantics = [#tpu.dimension_semantics<parallel>], iteration_bounds = array<i64: 1>, scalar_prefetch = 0 : i64, scratch_operands = 0 : i64, tpu.core_type = #tpu.core_type<tc>, window_params = [{transform_indices = @transform_0, window_bounds = array<i64: 10, 32>}, {pipeline_mode = #tpu.pipeline_mode<synchronous>, transform_indices = @transform_1, window_bounds = array<i64: 1, 32>}, {pipeline_mode = #tpu.pipeline_mode<synchronous>, transform_indices = @transform_2, window_bounds = array<i64: 1, 32>}, {pipeline_mode = #tpu.pipeline_mode<synchronous>, transform_indices = @transform_3, window_bounds = array<i64: 32, 64>}, {pipeline_mode = #tpu.pipeline_mode<synchronous>, transform_indices = @transform_4, window_bounds = array<i64: 1, 64>}, {pipeline_mode = #tpu.pipeline_mode<synchronous>, transform_indices = @transform_5, window_bounds = array<i64: 64, 32>}, {pipeline_mode = #tpu.pipeline_mode<synchronous>, transform_indices = @transform_6, window_bounds = array<i64: 1, 32>}, {transform_indices = @transform_7, window_bounds = array<i64: 10, 32>}]} {
    %c0 = arith.constant 0 : index
    %c0_0 = arith.constant 0 : index
    %0 = vector.load %arg1[%c0, %c0_0] : memref<10x32xbf16, #tpu.memory_space<vmem>>, vector<10x32xbf16>
    %1 = arith.extf %0 : vector<10x32xbf16> to vector<10x32xf32>
    %c0_1 = arith.constant 0 : index
    %c0_2 = arith.constant 0 : index
    %2 = vector.load %arg2[%c0_1, %c0_2] : memref<1x32xf32, #tpu.memory_space<vmem>>, vector<1x32xf32>
    %c0_3 = arith.constant 0 : index
    %c0_4 = arith.constant 0 : index
    %3 = vector.load %arg3[%c0_3, %c0_4] : memref<1x32xf32, #tpu.memory_space<vmem>>, vector<1x32xf32>
    %cst = arith.constant dense<0.000000e+00> : vector<10xf32>
    %4 = vector.multi_reduction <add>, %1, %cst [1] : vector<10x32xf32> to vector<10xf32>
    %5 = vector.shape_cast %4 : vector<10xf32> to vector<10x1xf32>
    %cst_5 = arith.constant 3.200000e+01 : f32
    %6 = vector.broadcast %cst_5 : f32 to vector<10x1xf32>
    %7 = arith.divf %5, %6 : vector<10x1xf32>
    %8 = vector.broadcast %7 : vector<10x1xf32> to vector<10x32xf32>
    %9 = arith.subf %1, %8 : vector<10x32xf32>
    %10 = arith.mulf %9, %9 : vector<10x32xf32>
    %cst_6 = arith.constant dense<0.000000e+00> : vector<10xf32>
    %11 = vector.multi_reduction <add>, %10, %cst_6 [1] : vector<10x32xf32> to vector<10xf32>
    %12 = vector.shape_cast %11 : vector<10xf32> to vector<10x1xf32>
    %cst_7 = arith.constant 3.200000e+01 : f32
    %13 = vector.broadcast %cst_7 : f32 to vector<10x1xf32>
    %14 = arith.divf %12, %13 : vector<10x1xf32>
    %cst_8 = arith.constant 9.99999996E-13 : f32
    %15 = vector.broadcast %cst_8 : f32 to vector<10x1xf32>
    %16 = arith.addf %14, %15 : vector<10x1xf32>
    %17 = math.rsqrt %16 : vector<10x1xf32>
    %18 = vector.broadcast %17 : vector<10x1xf32> to vector<10x32xf32>
    %19 = arith.mulf %9, %18 : vector<10x32xf32>
    %20 = vector.broadcast %2 : vector<1x32xf32> to vector<10x32xf32>
    %21 = arith.mulf %19, %20 : vector<10x32xf32>
    %22 = vector.broadcast %3 : vector<1x32xf32> to vector<10x32xf32>
    %23 = arith.addf %21, %22 : vector<10x32xf32>
    %24 = arith.truncf %23 : vector<10x32xf32> to vector<10x32xbf16>
    %c0_9 = arith.constant 0 : index
    %c0_10 = arith.constant 0 : index
    %25 = vector.load %arg4[%c0_9, %c0_10] : memref<32x64xbf16, #tpu.memory_space<vmem>>, vector<32x64xbf16>
    %cst_11 = arith.constant dense<0.000000e+00> : vector<10x64xf32>
    %26 = tpu.matmul %24, %25, %cst_11 {dimension_numbers = #tpu.dot_dimension_numbers<[1], [0], [0], [1], [0, 0, 1, 1], [], []>} : vector<10x32xbf16>, vector<32x64xbf16>, vector<10x64xf32> -> vector<10x64xf32>
    %c0_12 = arith.constant 0 : index
    %c0_13 = arith.constant 0 : index
    %27 = vector.load %arg5[%c0_12, %c0_13] : memref<1x64xf32, #tpu.memory_space<vmem>>, vector<1x64xf32>
    %28 = vector.broadcast %27 : vector<1x64xf32> to vector<10x64xf32>
    %29 = arith.addf %26, %28 : vector<10x64xf32>
    %cst_14 = arith.constant 5.000000e-01 : f32
    %30 = vector.broadcast %cst_14 : f32 to vector<10x64xf32>
    %31 = arith.mulf %30, %29 : vector<10x64xf32>
    %cst_15 = arith.constant 4.471500e-02 : f32
    %32 = vector.broadcast %cst_15 : f32 to vector<10x64xf32>
    %33 = arith.mulf %32, %29 : vector<10x64xf32>
    %34 = arith.mulf %33, %29 : vector<10x64xf32>
    %35 = arith.mulf %34, %29 : vector<10x64xf32>
    %36 = arith.addf %29, %35 : vector<10x64xf32>
    %cst_16 = arith.constant 0.797884583 : f32
    %37 = vector.broadcast %cst_16 : f32 to vector<10x64xf32>
    %38 = arith.mulf %37, %36 : vector<10x64xf32>
    %39 = math.tanh %38 : vector<10x64xf32>
    %cst_17 = arith.constant 1.000000e+00 : f32
    %40 = vector.broadcast %cst_17 : f32 to vector<10x64xf32>
    %41 = arith.addf %40, %39 : vector<10x64xf32>
    %42 = arith.mulf %31, %41 : vector<10x64xf32>
    %43 = arith.truncf %42 : vector<10x64xf32> to vector<10x64xbf16>
    %c0_18 = arith.constant 0 : index
    %c0_19 = arith.constant 0 : index
    %44 = vector.load %arg6[%c0_18, %c0_19] : memref<64x32xbf16, #tpu.memory_space<vmem>>, vector<64x32xbf16>
    %cst_20 = arith.constant dense<0.000000e+00> : vector<10x32xf32>
    %45 = tpu.matmul %43, %44, %cst_20 {dimension_numbers = #tpu.dot_dimension_numbers<[1], [0], [0], [1], [0, 0, 1, 1], [], []>} : vector<10x64xbf16>, vector<64x32xbf16>, vector<10x32xf32> -> vector<10x32xf32>
    %c0_21 = arith.constant 0 : index
    %c0_22 = arith.constant 0 : index
    %46 = vector.load %arg7[%c0_21, %c0_22] : memref<1x32xf32, #tpu.memory_space<vmem>>, vector<1x32xf32>
    %47 = vector.broadcast %46 : vector<1x32xf32> to vector<10x32xf32>
    %48 = arith.addf %45, %47 : vector<10x32xf32>
    %49 = arith.addf %48, %1 : vector<10x32xf32>
    %50 = arith.truncf %49 : vector<10x32xf32> to vector<10x32xbf16>
    %c0_23 = arith.constant 0 : index
    %c0_24 = arith.constant 0 : index
    %51 = vector.load %arg8[%c0_23, %c0_24] : memref<10x32xbf16, #tpu.memory_space<vmem>>, vector<10x32xbf16>
    tpu.vector_store %arg8[%c0_23, %c0_24], %50 {strides = array<i32>} : memref<10x32xbf16, #tpu.memory_space<vmem>>, vector<10x32xbf16>,
    return
  }
  func.func @transform_0(%arg0: i32) -> (i32, i32) {
    %c0_i32 = arith.constant 0 : i32
    %c0_i32_0 = arith.constant 0 : i32
    return %arg0, %c0_i32 : i32, i32
  }
  func.func @transform_1(%arg0: i32) -> (i32, i32) {
    %c0_i32 = arith.constant 0 : i32
    %c0_i32_0 = arith.constant 0 : i32
    %c0_i32_1 = arith.constant 0 : i32
    return %c0_i32, %c0_i32_0 : i32, i32
  }
  func.func @transform_2(%arg0: i32) -> (i32, i32) {
    %c0_i32 = arith.constant 0 : i32
    %c0_i32_0 = arith.constant 0 : i32
    %c0_i32_1 = arith.constant 0 : i32
    return %c0_i32, %c0_i32_0 : i32, i32
  }
  func.func @transform_3(%arg0: i32) -> (i32, i32) {
    %c0_i32 = arith.constant 0 : i32
    %c0_i32_0 = arith.constant 0 : i32
    %c0_i32_1 = arith.constant 0 : i32
    return %c0_i32, %c0_i32_0 : i32, i32
  }
  func.func @transform_4(%arg0: i32) -> (i32, i32) {
    %c0_i32 = arith.constant 0 : i32
    %c0_i32_0 = arith.constant 0 : i32
    %c0_i32_1 = arith.constant 0 : i32
    return %c0_i32, %c0_i32_0 : i32, i32
  }
  func.func @transform_5(%arg0: i32) -> (i32, i32) {
    %c0_i32 = arith.constant 0 : i32
    %c0_i32_0 = arith.constant 0 : i32
    %c0_i32_1 = arith.constant 0 : i32
    return %c0_i32, %c0_i32_0 : i32, i32
  }
  func.func @transform_6(%arg0: i32) -> (i32, i32) {
    %c0_i32 = arith.constant 0 : i32
    %c0_i32_0 = arith.constant 0 : i32
    %c0_i32_1 = arith.constant 0 : i32
    return %c0_i32, %c0_i32_0 : i32, i32
  }
  func.func @transform_7(%arg0: i32) -> (i32, i32) {
    %c0_i32 = arith.constant 0 : i32
    %c0_i32_0 = arith.constant 0 : i32
    return %arg0, %c0_i32 : i32, i32
  }
}

module attributes {stable_mosaic.version = 11 : i64} {
  func.func @_attention_kernel(%arg0: i32, %arg1: memref<1x5x96xbf16, #tpu.memory_space<vmem>>, %arg2: memref<32x32xbf16, #tpu.memory_space<vmem>>, %arg3: memref<1x32xf32, #tpu.memory_space<vmem>>, %arg4: memref<1x5x32xbf16, #tpu.memory_space<vmem>>, %arg5: memref<1x5x32xbf16, #tpu.memory_space<vmem>>, %arg6: memref<5x32xf32, #tpu.memory_space<vmem>>) attributes {dimension_semantics = [#tpu.dimension_semantics<parallel>], iteration_bounds = array<i64: 2>, scalar_prefetch = 0 : i64, scratch_operands = 1 : i64, tpu.core_type = #tpu.core_type<tc>, window_params = [{transform_indices = @transform_0, window_bounds = array<i64: 1, 5, 96>}, {pipeline_mode = #tpu.pipeline_mode<synchronous>, transform_indices = @transform_1, window_bounds = array<i64: 32, 32>}, {pipeline_mode = #tpu.pipeline_mode<synchronous>, transform_indices = @transform_2, window_bounds = array<i64: 1, 32>}, {transform_indices = @transform_3, window_bounds = array<i64: 1, 5, 32>}, {transform_indices = @transform_4, window_bounds = array<i64: 1, 5, 32>}]} {
    %c0 = arith.constant 0 : index
    %c0_0 = arith.constant 0 : index
    %c0_1 = arith.constant 0 : index
    %0 = vector.load %arg1[%c0, %c0_0, %c0_1] : memref<1x5x96xbf16, #tpu.memory_space<vmem>>, vector<1x5x8xbf16>
    %1 = vector.shape_cast %0 : vector<1x5x8xbf16> to vector<5x8xbf16>
    %c0_2 = arith.constant 0 : index
    %c0_3 = arith.constant 0 : index
    %c32 = arith.constant 32 : index
    %2 = vector.load %arg1[%c0_2, %c0_3, %c32] : memref<1x5x96xbf16, #tpu.memory_space<vmem>>, vector<1x5x8xbf16>
    %3 = vector.shape_cast %2 : vector<1x5x8xbf16> to vector<5x8xbf16>
    %c0_4 = arith.constant 0 : index
    %c0_5 = arith.constant 0 : index
    %c64 = arith.constant 64 : index
    %4 = vector.load %arg1[%c0_4, %c0_5, %c64] : memref<1x5x96xbf16, #tpu.memory_space<vmem>>, vector<1x5x8xbf16>
    %5 = vector.shape_cast %4 : vector<1x5x8xbf16> to vector<5x8xbf16>
    %cst = arith.constant dense<0.000000e+00> : vector<5x5xf32>
    %6 = tpu.matmul %1, %3, %cst {dimension_numbers = #tpu.dot_dimension_numbers<[1], [1], [0], [0], [0, 0, 1, 0], [], []>} : vector<5x8xbf16>, vector<5x8xbf16>, vector<5x5xf32> -> vector<5x5xf32>
    %cst_6 = arith.constant dense<0xFF800000> : vector<5xf32>
    %7 = vector.multi_reduction <maximumf>, %6, %cst_6 [1] : vector<5x5xf32> to vector<5xf32>
    %8 = vector.shape_cast %7 : vector<5xf32> to vector<5x1xf32>
    %9 = vector.broadcast %8 : vector<5x1xf32> to vector<5x5xf32>
    %10 = arith.subf %6, %9 : vector<5x5xf32>
    %11 = math.exp %10 : vector<5x5xf32>
    %cst_7 = arith.constant dense<0.000000e+00> : vector<5xf32>
    %12 = vector.multi_reduction <add>, %11, %cst_7 [1] : vector<5x5xf32> to vector<5xf32>
    %13 = vector.shape_cast %12 : vector<5xf32> to vector<5x1xf32>
    %14 = vector.broadcast %13 : vector<5x1xf32> to vector<5x5xf32>
    %15 = arith.divf %11, %14 : vector<5x5xf32>
    %16 = arith.truncf %15 : vector<5x5xf32> to vector<5x5xbf16>
    %cst_8 = arith.constant dense<0.000000e+00> : vector<5x8xf32>
    %17 = tpu.matmul %16, %5, %cst_8 {dimension_numbers = #tpu.dot_dimension_numbers<[1], [0], [0], [1], [0, 0, 1, 1], [], []>} : vector<5x5xbf16>, vector<5x8xbf16>, vector<5x8xf32> -> vector<5x8xf32>
    %18 = arith.truncf %17 : vector<5x8xf32> to vector<5x8xbf16>
    %c0_9 = arith.constant 0 : index
    %c0_10 = arith.constant 0 : index
    %19 = vector.load %arg2[%c0_9, %c0_10] : memref<32x32xbf16, #tpu.memory_space<vmem>>, vector<8x32xbf16>
    %cst_11 = arith.constant dense<0.000000e+00> : vector<5x32xf32>
    %20 = tpu.matmul %18, %19, %cst_11 {dimension_numbers = #tpu.dot_dimension_numbers<[1], [0], [0], [1], [0, 0, 1, 1], [], []>} : vector<5x8xbf16>, vector<8x32xbf16>, vector<5x32xf32> -> vector<5x32xf32>
    %c0_12 = arith.constant 0 : index
    %c0_13 = arith.constant 0 : index
    %21 = vector.load %arg6[%c0_12, %c0_13] : memref<5x32xf32, #tpu.memory_space<vmem>>, vector<5x32xf32>
    tpu.vector_store %arg6[%c0_12, %c0_13], %20 {strides = array<i32>} : memref<5x32xf32, #tpu.memory_space<vmem>>, vector<5x32xf32>,
    %c0_14 = arith.constant 0 : index
    %c0_15 = arith.constant 0 : index
    %c8 = arith.constant 8 : index
    %22 = vector.load %arg1[%c0_14, %c0_15, %c8] : memref<1x5x96xbf16, #tpu.memory_space<vmem>>, vector<1x5x8xbf16>
    %23 = vector.shape_cast %22 : vector<1x5x8xbf16> to vector<5x8xbf16>
    %c0_16 = arith.constant 0 : index
    %c0_17 = arith.constant 0 : index
    %c40 = arith.constant 40 : index
    %24 = vector.load %arg1[%c0_16, %c0_17, %c40] : memref<1x5x96xbf16, #tpu.memory_space<vmem>>, vector<1x5x8xbf16>
    %25 = vector.shape_cast %24 : vector<1x5x8xbf16> to vector<5x8xbf16>
    %c0_18 = arith.constant 0 : index
    %c0_19 = arith.constant 0 : index
    %c72 = arith.constant 72 : index
    %26 = vector.load %arg1[%c0_18, %c0_19, %c72] : memref<1x5x96xbf16, #tpu.memory_space<vmem>>, vector<1x5x8xbf16>
    %27 = vector.shape_cast %26 : vector<1x5x8xbf16> to vector<5x8xbf16>
    %cst_20 = arith.constant dense<0.000000e+00> : vector<5x5xf32>
    %28 = tpu.matmul %23, %25, %cst_20 {dimension_numbers = #tpu.dot_dimension_numbers<[1], [1], [0], [0], [0, 0, 1, 0], [], []>} : vector<5x8xbf16>, vector<5x8xbf16>, vector<5x5xf32> -> vector<5x5xf32>
    %cst_21 = arith.constant dense<0xFF800000> : vector<5xf32>
    %29 = vector.multi_reduction <maximumf>, %28, %cst_21 [1] : vector<5x5xf32> to vector<5xf32>
    %30 = vector.shape_cast %29 : vector<5xf32> to vector<5x1xf32>
    %31 = vector.broadcast %30 : vector<5x1xf32> to vector<5x5xf32>
    %32 = arith.subf %28, %31 : vector<5x5xf32>
    %33 = math.exp %32 : vector<5x5xf32>
    %cst_22 = arith.constant dense<0.000000e+00> : vector<5xf32>
    %34 = vector.multi_reduction <add>, %33, %cst_22 [1] : vector<5x5xf32> to vector<5xf32>
    %35 = vector.shape_cast %34 : vector<5xf32> to vector<5x1xf32>
    %36 = vector.broadcast %35 : vector<5x1xf32> to vector<5x5xf32>
    %37 = arith.divf %33, %36 : vector<5x5xf32>
    %38 = arith.truncf %37 : vector<5x5xf32> to vector<5x5xbf16>
    %cst_23 = arith.constant dense<0.000000e+00> : vector<5x8xf32>
    %39 = tpu.matmul %38, %27, %cst_23 {dimension_numbers = #tpu.dot_dimension_numbers<[1], [0], [0], [1], [0, 0, 1, 1], [], []>} : vector<5x5xbf16>, vector<5x8xbf16>, vector<5x8xf32> -> vector<5x8xf32>
    %40 = arith.truncf %39 : vector<5x8xf32> to vector<5x8xbf16>
    %c8_24 = arith.constant 8 : index
    %c0_25 = arith.constant 0 : index
    %41 = vector.load %arg2[%c8_24, %c0_25] : memref<32x32xbf16, #tpu.memory_space<vmem>>, vector<8x32xbf16>
    %cst_26 = arith.constant dense<0.000000e+00> : vector<5x32xf32>
    %42 = tpu.matmul %40, %41, %cst_26 {dimension_numbers = #tpu.dot_dimension_numbers<[1], [0], [0], [1], [0, 0, 1, 1], [], []>} : vector<5x8xbf16>, vector<8x32xbf16>, vector<5x32xf32> -> vector<5x32xf32>
    %c0_27 = arith.constant 0 : index
    %c0_28 = arith.constant 0 : index
    %43 = vector.load %arg6[%c0_27, %c0_28] : memref<5x32xf32, #tpu.memory_space<vmem>>, vector<5x32xf32>
    %44 = arith.addf %43, %42 : vector<5x32xf32>
    %c0_29 = arith.constant 0 : index
    %c0_30 = arith.constant 0 : index
    %45 = vector.load %arg6[%c0_29, %c0_30] : memref<5x32xf32, #tpu.memory_space<vmem>>, vector<5x32xf32>
    tpu.vector_store %arg6[%c0_29, %c0_30], %44 {strides = array<i32>} : memref<5x32xf32, #tpu.memory_space<vmem>>, vector<5x32xf32>,
    %c0_31 = arith.constant 0 : index
    %c0_32 = arith.constant 0 : index
    %c16 = arith.constant 16 : index
    %46 = vector.load %arg1[%c0_31, %c0_32, %c16] : memref<1x5x96xbf16, #tpu.memory_space<vmem>>, vector<1x5x8xbf16>
    %47 = vector.shape_cast %46 : vector<1x5x8xbf16> to vector<5x8xbf16>
    %c0_33 = arith.constant 0 : index
    %c0_34 = arith.constant 0 : index
    %c48 = arith.constant 48 : index
    %48 = vector.load %arg1[%c0_33, %c0_34, %c48] : memref<1x5x96xbf16, #tpu.memory_space<vmem>>, vector<1x5x8xbf16>
    %49 = vector.shape_cast %48 : vector<1x5x8xbf16> to vector<5x8xbf16>
    %c0_35 = arith.constant 0 : index
    %c0_36 = arith.constant 0 : index
    %c80 = arith.constant 80 : index
    %50 = vector.load %arg1[%c0_35, %c0_36, %c80] : memref<1x5x96xbf16, #tpu.memory_space<vmem>>, vector<1x5x8xbf16>
    %51 = vector.shape_cast %50 : vector<1x5x8xbf16> to vector<5x8xbf16>
    %cst_37 = arith.constant dense<0.000000e+00> : vector<5x5xf32>
    %52 = tpu.matmul %47, %49, %cst_37 {dimension_numbers = #tpu.dot_dimension_numbers<[1], [1], [0], [0], [0, 0, 1, 0], [], []>} : vector<5x8xbf16>, vector<5x8xbf16>, vector<5x5xf32> -> vector<5x5xf32>
    %cst_38 = arith.constant dense<0xFF800000> : vector<5xf32>
    %53 = vector.multi_reduction <maximumf>, %52, %cst_38 [1] : vector<5x5xf32> to vector<5xf32>
    %54 = vector.shape_cast %53 : vector<5xf32> to vector<5x1xf32>
    %55 = vector.broadcast %54 : vector<5x1xf32> to vector<5x5xf32>
    %56 = arith.subf %52, %55 : vector<5x5xf32>
    %57 = math.exp %56 : vector<5x5xf32>
    %cst_39 = arith.constant dense<0.000000e+00> : vector<5xf32>
    %58 = vector.multi_reduction <add>, %57, %cst_39 [1] : vector<5x5xf32> to vector<5xf32>
    %59 = vector.shape_cast %58 : vector<5xf32> to vector<5x1xf32>
    %60 = vector.broadcast %59 : vector<5x1xf32> to vector<5x5xf32>
    %61 = arith.divf %57, %60 : vector<5x5xf32>
    %62 = arith.truncf %61 : vector<5x5xf32> to vector<5x5xbf16>
    %cst_40 = arith.constant dense<0.000000e+00> : vector<5x8xf32>
    %63 = tpu.matmul %62, %51, %cst_40 {dimension_numbers = #tpu.dot_dimension_numbers<[1], [0], [0], [1], [0, 0, 1, 1], [], []>} : vector<5x5xbf16>, vector<5x8xbf16>, vector<5x8xf32> -> vector<5x8xf32>
    %64 = arith.truncf %63 : vector<5x8xf32> to vector<5x8xbf16>
    %c16_41 = arith.constant 16 : index
    %c0_42 = arith.constant 0 : index
    %65 = vector.load %arg2[%c16_41, %c0_42] : memref<32x32xbf16, #tpu.memory_space<vmem>>, vector<8x32xbf16>
    %cst_43 = arith.constant dense<0.000000e+00> : vector<5x32xf32>
    %66 = tpu.matmul %64, %65, %cst_43 {dimension_numbers = #tpu.dot_dimension_numbers<[1], [0], [0], [1], [0, 0, 1, 1], [], []>} : vector<5x8xbf16>, vector<8x32xbf16>, vector<5x32xf32> -> vector<5x32xf32>
    %c0_44 = arith.constant 0 : index
    %c0_45 = arith.constant 0 : index
    %67 = vector.load %arg6[%c0_44, %c0_45] : memref<5x32xf32, #tpu.memory_space<vmem>>, vector<5x32xf32>
    %68 = arith.addf %67, %66 : vector<5x32xf32>
    %c0_46 = arith.constant 0 : index
    %c0_47 = arith.constant 0 : index
    %69 = vector.load %arg6[%c0_46, %c0_47] : memref<5x32xf32, #tpu.memory_space<vmem>>, vector<5x32xf32>
    tpu.vector_store %arg6[%c0_46, %c0_47], %68 {strides = array<i32>} : memref<5x32xf32, #tpu.memory_space<vmem>>, vector<5x32xf32>,
    %c0_48 = arith.constant 0 : index
    %c0_49 = arith.constant 0 : index
    %c24 = arith.constant 24 : index
    %70 = vector.load %arg1[%c0_48, %c0_49, %c24] : memref<1x5x96xbf16, #tpu.memory_space<vmem>>, vector<1x5x8xbf16>
    %71 = vector.shape_cast %70 : vector<1x5x8xbf16> to vector<5x8xbf16>
    %c0_50 = arith.constant 0 : index
    %c0_51 = arith.constant 0 : index
    %c56 = arith.constant 56 : index
    %72 = vector.load %arg1[%c0_50, %c0_51, %c56] : memref<1x5x96xbf16, #tpu.memory_space<vmem>>, vector<1x5x8xbf16>
    %73 = vector.shape_cast %72 : vector<1x5x8xbf16> to vector<5x8xbf16>
    %c0_52 = arith.constant 0 : index
    %c0_53 = arith.constant 0 : index
    %c88 = arith.constant 88 : index
    %74 = vector.load %arg1[%c0_52, %c0_53, %c88] : memref<1x5x96xbf16, #tpu.memory_space<vmem>>, vector<1x5x8xbf16>
    %75 = vector.shape_cast %74 : vector<1x5x8xbf16> to vector<5x8xbf16>
    %cst_54 = arith.constant dense<0.000000e+00> : vector<5x5xf32>
    %76 = tpu.matmul %71, %73, %cst_54 {dimension_numbers = #tpu.dot_dimension_numbers<[1], [1], [0], [0], [0, 0, 1, 0], [], []>} : vector<5x8xbf16>, vector<5x8xbf16>, vector<5x5xf32> -> vector<5x5xf32>
    %cst_55 = arith.constant dense<0xFF800000> : vector<5xf32>
    %77 = vector.multi_reduction <maximumf>, %76, %cst_55 [1] : vector<5x5xf32> to vector<5xf32>
    %78 = vector.shape_cast %77 : vector<5xf32> to vector<5x1xf32>
    %79 = vector.broadcast %78 : vector<5x1xf32> to vector<5x5xf32>
    %80 = arith.subf %76, %79 : vector<5x5xf32>
    %81 = math.exp %80 : vector<5x5xf32>
    %cst_56 = arith.constant dense<0.000000e+00> : vector<5xf32>
    %82 = vector.multi_reduction <add>, %81, %cst_56 [1] : vector<5x5xf32> to vector<5xf32>
    %83 = vector.shape_cast %82 : vector<5xf32> to vector<5x1xf32>
    %84 = vector.broadcast %83 : vector<5x1xf32> to vector<5x5xf32>
    %85 = arith.divf %81, %84 : vector<5x5xf32>
    %86 = arith.truncf %85 : vector<5x5xf32> to vector<5x5xbf16>
    %cst_57 = arith.constant dense<0.000000e+00> : vector<5x8xf32>
    %87 = tpu.matmul %86, %75, %cst_57 {dimension_numbers = #tpu.dot_dimension_numbers<[1], [0], [0], [1], [0, 0, 1, 1], [], []>} : vector<5x5xbf16>, vector<5x8xbf16>, vector<5x8xf32> -> vector<5x8xf32>
    %88 = arith.truncf %87 : vector<5x8xf32> to vector<5x8xbf16>
    %c24_58 = arith.constant 24 : index
    %c0_59 = arith.constant 0 : index
    %89 = vector.load %arg2[%c24_58, %c0_59] : memref<32x32xbf16, #tpu.memory_space<vmem>>, vector<8x32xbf16>
    %cst_60 = arith.constant dense<0.000000e+00> : vector<5x32xf32>
    %90 = tpu.matmul %88, %89, %cst_60 {dimension_numbers = #tpu.dot_dimension_numbers<[1], [0], [0], [1], [0, 0, 1, 1], [], []>} : vector<5x8xbf16>, vector<8x32xbf16>, vector<5x32xf32> -> vector<5x32xf32>
    %c0_61 = arith.constant 0 : index
    %c0_62 = arith.constant 0 : index
    %91 = vector.load %arg6[%c0_61, %c0_62] : memref<5x32xf32, #tpu.memory_space<vmem>>, vector<5x32xf32>
    %92 = arith.addf %91, %90 : vector<5x32xf32>
    %c0_63 = arith.constant 0 : index
    %c0_64 = arith.constant 0 : index
    %93 = vector.load %arg6[%c0_63, %c0_64] : memref<5x32xf32, #tpu.memory_space<vmem>>, vector<5x32xf32>
    tpu.vector_store %arg6[%c0_63, %c0_64], %92 {strides = array<i32>} : memref<5x32xf32, #tpu.memory_space<vmem>>, vector<5x32xf32>,
    %c0_65 = arith.constant 0 : index
    %c0_66 = arith.constant 0 : index
    %94 = vector.load %arg6[%c0_65, %c0_66] : memref<5x32xf32, #tpu.memory_space<vmem>>, vector<5x32xf32>
    %c0_67 = arith.constant 0 : index
    %c0_68 = arith.constant 0 : index
    %95 = vector.load %arg3[%c0_67, %c0_68] : memref<1x32xf32, #tpu.memory_space<vmem>>, vector<1x32xf32>
    %96 = vector.broadcast %95 : vector<1x32xf32> to vector<5x32xf32>
    %97 = arith.addf %94, %96 : vector<5x32xf32>
    %c0_69 = arith.constant 0 : index
    %c0_70 = arith.constant 0 : index
    %c0_71 = arith.constant 0 : index
    %98 = vector.load %arg4[%c0_69, %c0_70, %c0_71] : memref<1x5x32xbf16, #tpu.memory_space<vmem>>, vector<1x5x32xbf16>
    %99 = vector.shape_cast %98 : vector<1x5x32xbf16> to vector<5x32xbf16>
    %100 = arith.extf %99 : vector<5x32xbf16> to vector<5x32xf32>
    %101 = arith.addf %97, %100 : vector<5x32xf32>
    %102 = arith.truncf %101 : vector<5x32xf32> to vector<5x32xbf16>
    %c0_72 = arith.constant 0 : index
    %c0_73 = arith.constant 0 : index
    %c0_74 = arith.constant 0 : index
    %103 = vector.load %arg5[%c0_72, %c0_73, %c0_74] : memref<1x5x32xbf16, #tpu.memory_space<vmem>>, vector<1x5x32xbf16>
    %104 = vector.shape_cast %103 : vector<1x5x32xbf16> to vector<5x32xbf16>
    %105 = vector.shape_cast %102 : vector<5x32xbf16> to vector<1x5x32xbf16>
    tpu.vector_store %arg5[%c0_72, %c0_73, %c0_74], %105 {strides = array<i32>} : memref<1x5x32xbf16, #tpu.memory_space<vmem>>, vector<1x5x32xbf16>,
    return
  }
  func.func @transform_0(%arg0: i32) -> (i32, i32, i32) {
    %c0_i32 = arith.constant 0 : i32
    %c0_i32_0 = arith.constant 0 : i32
    %c0_i32_1 = arith.constant 0 : i32
    return %arg0, %c0_i32, %c0_i32_0 : i32, i32, i32
  }
  func.func @transform_1(%arg0: i32) -> (i32, i32) {
    %c0_i32 = arith.constant 0 : i32
    %c0_i32_0 = arith.constant 0 : i32
    %c0_i32_1 = arith.constant 0 : i32
    return %c0_i32, %c0_i32_0 : i32, i32
  }
  func.func @transform_2(%arg0: i32) -> (i32, i32) {
    %c0_i32 = arith.constant 0 : i32
    %c0_i32_0 = arith.constant 0 : i32
    %c0_i32_1 = arith.constant 0 : i32
    return %c0_i32, %c0_i32_0 : i32, i32
  }
  func.func @transform_3(%arg0: i32) -> (i32, i32, i32) {
    %c0_i32 = arith.constant 0 : i32
    %c0_i32_0 = arith.constant 0 : i32
    %c0_i32_1 = arith.constant 0 : i32
    return %arg0, %c0_i32, %c0_i32_0 : i32, i32, i32
  }
  func.func @transform_4(%arg0: i32) -> (i32, i32, i32) {
    %c0_i32 = arith.constant 0 : i32
    %c0_i32_0 = arith.constant 0 : i32
    %c0_i32_1 = arith.constant 0 : i32
    return %arg0, %c0_i32, %c0_i32_0 : i32, i32, i32
  }
}

module attributes {stable_mosaic.version = 11 : i64} {
  func.func @_layernorm_kernel(%arg0: i32, %arg1: memref<10x32xbf16, #tpu.memory_space<vmem>>, %arg2: memref<1x32xf32, #tpu.memory_space<vmem>>, %arg3: memref<1x32xf32, #tpu.memory_space<vmem>>, %arg4: memref<10x32xf32, #tpu.memory_space<vmem>>) attributes {dimension_semantics = [#tpu.dimension_semantics<parallel>], iteration_bounds = array<i64: 1>, scalar_prefetch = 0 : i64, scratch_operands = 0 : i64, tpu.core_type = #tpu.core_type<tc>, window_params = [{transform_indices = @transform_0, window_bounds = array<i64: 10, 32>}, {pipeline_mode = #tpu.pipeline_mode<synchronous>, transform_indices = @transform_1, window_bounds = array<i64: 1, 32>}, {pipeline_mode = #tpu.pipeline_mode<synchronous>, transform_indices = @transform_2, window_bounds = array<i64: 1, 32>}, {transform_indices = @transform_3, window_bounds = array<i64: 10, 32>}]} {
    %c0 = arith.constant 0 : index
    %c0_0 = arith.constant 0 : index
    %0 = vector.load %arg1[%c0, %c0_0] : memref<10x32xbf16, #tpu.memory_space<vmem>>, vector<10x32xbf16>
    %1 = arith.extf %0 : vector<10x32xbf16> to vector<10x32xf32>
    %c0_1 = arith.constant 0 : index
    %c0_2 = arith.constant 0 : index
    %2 = vector.load %arg2[%c0_1, %c0_2] : memref<1x32xf32, #tpu.memory_space<vmem>>, vector<1x32xf32>
    %c0_3 = arith.constant 0 : index
    %c0_4 = arith.constant 0 : index
    %3 = vector.load %arg3[%c0_3, %c0_4] : memref<1x32xf32, #tpu.memory_space<vmem>>, vector<1x32xf32>
    %cst = arith.constant dense<0.000000e+00> : vector<10xf32>
    %4 = vector.multi_reduction <add>, %1, %cst [1] : vector<10x32xf32> to vector<10xf32>
    %5 = vector.shape_cast %4 : vector<10xf32> to vector<10x1xf32>
    %cst_5 = arith.constant 3.200000e+01 : f32
    %6 = vector.broadcast %cst_5 : f32 to vector<10x1xf32>
    %7 = arith.divf %5, %6 : vector<10x1xf32>
    %8 = vector.broadcast %7 : vector<10x1xf32> to vector<10x32xf32>
    %9 = arith.subf %1, %8 : vector<10x32xf32>
    %10 = arith.mulf %9, %9 : vector<10x32xf32>
    %cst_6 = arith.constant dense<0.000000e+00> : vector<10xf32>
    %11 = vector.multi_reduction <add>, %10, %cst_6 [1] : vector<10x32xf32> to vector<10xf32>
    %12 = vector.shape_cast %11 : vector<10xf32> to vector<10x1xf32>
    %cst_7 = arith.constant 3.200000e+01 : f32
    %13 = vector.broadcast %cst_7 : f32 to vector<10x1xf32>
    %14 = arith.divf %12, %13 : vector<10x1xf32>
    %cst_8 = arith.constant 9.99999996E-13 : f32
    %15 = vector.broadcast %cst_8 : f32 to vector<10x1xf32>
    %16 = arith.addf %14, %15 : vector<10x1xf32>
    %17 = math.rsqrt %16 : vector<10x1xf32>
    %18 = vector.broadcast %17 : vector<10x1xf32> to vector<10x32xf32>
    %19 = arith.mulf %9, %18 : vector<10x32xf32>
    %20 = vector.broadcast %2 : vector<1x32xf32> to vector<10x32xf32>
    %21 = arith.mulf %19, %20 : vector<10x32xf32>
    %22 = vector.broadcast %3 : vector<1x32xf32> to vector<10x32xf32>
    %23 = arith.addf %21, %22 : vector<10x32xf32>
    %c0_9 = arith.constant 0 : index
    %c0_10 = arith.constant 0 : index
    %24 = vector.load %arg4[%c0_9, %c0_10] : memref<10x32xf32, #tpu.memory_space<vmem>>, vector<10x32xf32>
    tpu.vector_store %arg4[%c0_9, %c0_10], %23 {strides = array<i32>} : memref<10x32xf32, #tpu.memory_space<vmem>>, vector<10x32xf32>,
    return
  }
  func.func @transform_0(%arg0: i32) -> (i32, i32) {
    %c0_i32 = arith.constant 0 : i32
    %c0_i32_0 = arith.constant 0 : i32
    return %arg0, %c0_i32 : i32, i32
  }
  func.func @transform_1(%arg0: i32) -> (i32, i32) {
    %c0_i32 = arith.constant 0 : i32
    %c0_i32_0 = arith.constant 0 : i32
    %c0_i32_1 = arith.constant 0 : i32
    return %c0_i32, %c0_i32_0 : i32, i32
  }
  func.func @transform_2(%arg0: i32) -> (i32, i32) {
    %c0_i32 = arith.constant 0 : i32
    %c0_i32_0 = arith.constant 0 : i32
    %c0_i32_1 = arith.constant 0 : i32
    return %c0_i32, %c0_i32_0 : i32, i32
  }
  func.func @transform_3(%arg0: i32) -> (i32, i32) {
    %c0_i32 = arith.constant 0 : i32
    %c0_i32_0 = arith.constant 0 : i32
    return %arg0, %c0_i32 : i32, i32
  }
}

</mosaic_0001>

<bundles_post_ra>
// kernel: image_encoder_forward.9
= control target key start
LH: loop header
LB: loop body
LE: loop exit
PB: predicated region body
PF: predicated region fallthrough
CT: control target
= control target key end

     0   :  { %vm27_vm0 = vcmask 261120   ;;  %vm31_vm1 = vcmask 254976   ;;  %v159_v6 = vmov 32.0   ;;  %vm130_vm9 = vcmask 781312   ;;  %s222_s0 = inlined_call_operand.vmem [shape: bf16[10,32], index: 0, kind: input, shape index: {}]   ;;  %s223_s1 = inlined_call_operand.vmem [shape: f32[1,32], index: 1, kind: input, shape index: {}]   ;;  %s224_s2 = inlined_call_operand.vmem [shape: f32[1,32], index: 2, kind: input, shape index: {}]   ;;  %s225_s4 = inlined_call_operand.vmem [shape: f32[1,96], index: 4, kind: input, shape index: {}]   ;;  %s226_s3 = inlined_call_operand.vmem [shape: bf16[32,96], index: 3, kind: input, shape index: {}]   ;;  %s227_s5 = inlined_call_operand.vmem [shape: bf16[10,96], index: 5, kind: output, shape index: {}]  }
   0x1   :  { %v21_v0 = vld [vmem:[%s222_s0] sm:$0xf]  ;;  %v22_v2 = vld [vmem:[%s222_s0 + $0x4] sm:$0x1]  ;;  %153 = vrcp.f32 %v159_v6  ;;  %v148_v23 = vld [vmem:[%s226_s3 + $0x8] sm:$0xff]  ;;  %vm132_vm10 = vcmask 778240  }
   0x2   :  { %v23_v1 = vunpack.c.l.bf16 %v21_v0  ;;  %v24_v4 = vunpack.c.l.bf16 %v22_v2  ;;  %120 = vmatpush.bf16.msra.mxu0 %v148_v23  ;;  %v147_v25 = vld [vmem:[%s226_s3] sm:$0xff] }
   0x3   :  { %v150_v44 = vld [vmem:[%s223_s1] ss:$0 sm:$0xff] }
   0x4   :  { %v28_v3 = vsel %vm27_vm0, %v23_v1, 0.0  ;;  %v32_v5 = vsel %vm31_vm1, %v24_v4, 0.0  ;;  %v151_v49 = vld [vmem:[%s224_s2] ss:$0 sm:$0xff] }
   0x5   :  { %29 = vadd.xlane.f32.xlu0 %v28_v3  ;;  %v152_v54 = vld [vmem:[%s225_s4] ss:$0 sm:$0xff] }
   0x6   :  { %121 = vmatpush.bf16.msra.mxu0 %v147_v25 }
   0x7   :  { %v154_v7 = vpop.eup %153 }
   0x8   :  { %v36_v8 = vmul.f32 32.0, %v154_v7  ;;  %vm40_vm2 = vweird.f32 %v154_v7 }
   0xa   :  { %v37_v9 = vsub.f32 1.0, %v36_v8 }
   0xc   :  { %v38_v10 = vmul.f32 %v154_v7, %v37_v9 }
   0xd   :  { %33 = vadd.xlane.f32.xlu0 %v32_v5 }
   0xe   :  { %v39_v11 = vadd.f32 %v154_v7, %v38_v10 }
  0x10   :  { %v41_v12 = vsel %vm40_vm2, %v154_v7, %v39_v11 }
  0x78   :  { %v30_v13 = vpop.xlane.xlu0 %29 }
  0x79   :  { %v42_v14 = vmul.f32 %v41_v12, %v30_v13 }
  0x7b   :  { %v44_v15 = vsub.f32 %v23_v1, %v42_v14 }
  0x7d   :  { %v46_v16 = vmul.f32 %v44_v15, %v44_v15 }
  0x7f   :  { %v48_v17 = vsel %vm27_vm0, %v46_v16, 0.0 }
  0x80   :  { %49 = vadd.xlane.f32.xlu1 %v48_v17  ;;  %v34_v18 = vpop.xlane.xlu0 %33 }
  0x81   :  { %v43_v19 = vmul.f32 %v41_v12, %v34_v18 }
  0x83   :  { %v45_v20 = vsub.f32 %v24_v4, %v43_v19 }
  0x85   :  { %v47_v21 = vmul.f32 %v45_v20, %v45_v20 }
  0x87   :  { %v51_v22 = vsel %vm31_vm1, %v47_v21, 0.0 }
  0x88   :  { %52 = vadd.xlane.f32.xlu1 %v51_v22 }
  0xf3   :  { %v50_v24 = vpop.xlane.xlu1 %49 }
  0xf4   :  { %v54_v26 = vmul.f32 %v50_v24, %v41_v12 }
  0xf6   :  { %v56_v27 = vadd.f32 1e-12, %v54_v26 }
  0xf8   :  { %155 = vrsqrt.f32 %v56_v27  ;;  %vm64_vm4 = vweird.f32 %v56_v27 }
  0xfb   :  { %v53_v28 = vpop.xlane.xlu1 %52 }
  0xfc   :  { %v55_v29 = vmul.f32 %v53_v28, %v41_v12 }
  0xfe   :  { %v156_v30 = vpop.eup %155  ;;  %v57_v31 = vadd.f32 1e-12, %v55_v29 }
  0xff   :  { %v59_v32 = vmul.f32 %v156_v30, %v56_v27  ;;  %vm65_vm3 = vweird.f32 %v156_v30 }
 0x100   :  { %157 = vrsqrt.f32 %v57_v31  ;;  %vm66_vm5 = vmor %vm64_vm4, %vm65_vm3  ;;  %vm74_vm7 = vweird.f32 %v57_v31 }
 0x101   :  { %v60_v33 = vmul.f32 %v156_v30, %v59_v32 }
 0x103   :  { %v61_v34 = vmul.f32 0.5, %v60_v33 }
 0x105   :  { %v62_v35 = vsub.f32 1.5, %v61_v34 }
 0x106   :  { %v158_v36 = vpop.eup %157 }
 0x107   :  { %v63_v37 = vmul.f32 %v156_v30, %v62_v35  ;;  %v69_v38 = vmul.f32 %v158_v36, %v57_v31  ;;  %vm75_vm6 = vweird.f32 %v158_v36 }
 0x108   :  { %vm76_vm8 = vmor %vm74_vm7, %vm75_vm6 }
 0x109   :  { %v70_v39 = vmul.f32 %v158_v36, %v69_v38  ;;  %v67_v40 = vsel %vm66_vm5, %v156_v30, %v63_v37 }
 0x10a   :  { %v78_v43 = vmul.f32 %v67_v40, %v44_v15 }
 0x10b   :  { %v71_v41 = vmul.f32 0.5, %v70_v39 }
 0x10c   :  { %v83_v48 = vmul.f32 %v150_v44, %v78_v43 }
 0x10d   :  { %v72_v42 = vsub.f32 1.5, %v71_v41 }
 0x10e   :  { %v88_v51 = vadd.f32 %v151_v49, %v83_v48 }
 0x10f   :  { %v73_v45 = vmul.f32 %v158_v36, %v72_v42 }
 0x111   :  { %v77_v46 = vsel %vm76_vm8, %v158_v36, %v73_v45 }
 0x112   :  { %v79_v47 = vmul.f32 %v77_v46, %v45_v20 }
 0x114   :  { %v84_v50 = vmul.f32 %v150_v44, %v79_v47 }
 0x116   :  { %v89_v52 = vadd.f32 %v151_v49, %v84_v50 }
 0x118   :  { %v90_v53 = vpack.c.bf16 %v89_v52, %v88_v51 }
 0x11a   :  { %146 = vmatmul.msk.bf16.vlgmr.msra.gmra.mxu0 %vm27_vm0, %v90_v53 }
 0x197   :  { %v123_v55 = vpop.f32.mrf.mxu0 }
 0x198   :  { %v124_v56 = vadd.f32 %v152_v54, %v123_v55 }
 0x19a   :  { %v128_v57 = vpack.c.bf16 %v124_v56, %v124_v56 }
 0x19c   :  { %131 = vst.msk [vmem:[%s227_s5] sm:$0xf] %vm130_vm9, %v128_v57 }
 0x19f   :  { %v125_v58 = vpop.f32.mrf.mxu0 }
 0x1a0   :  { %v126_v59 = vadd.f32 %v152_v54, %v125_v58 }
 0x1a2   :  { %v129_v60 = vpack.c.bf16 %v126_v59, %v126_v59 }
 0x1a4   :  { %133 = vst.msk [vmem:[%s227_s5 + $0x4] sm:$0x1] %vm132_vm10, %v129_v60 }

// kernel: image_encoder_forward.11
= control target key start
LH: loop header
LB: loop body
LE: loop exit
PB: predicated region body
PF: predicated region fallthrough
CT: control target
= control target key end

     0   :  { %vm33_vm0 = vcmask 261120   ;;  %vm37_vm1 = vcmask 254976   ;;  %v266_v6 = vmov 32.0   ;;  %vm189_vm9 = vcmask 523264   ;;  %s364_s0 = inlined_call_operand.vmem [shape: bf16[10,32], index: 0, kind: input, shape index: {}]   ;;  %s365_s1 = inlined_call_operand.vmem [shape: f32[1,32], index: 1, kind: input, shape index: {}]   ;;  %s366_s2 = inlined_call_operand.vmem [shape: f32[1,32], index: 2, kind: input, shape index: {}]   ;;  %s367_s4 = inlined_call_operand.vmem [shape: f32[1,64], index: 4, kind: input, shape index: {}]   ;;  %s368_s3 = inlined_call_operand.vmem [shape: bf16[32,64], index: 3, kind: input, shape index: {}]   ;;  %s369_s6 = inlined_call_operand.vmem [shape: f32[1,32], index: 6, kind: input, shape index: {}]   ;;  %s370_s5 = inlined_call_operand.vmem [shape: bf16[64,32], index: 5, kind: input, shape index: {}]   ;;  %s371_s7 = inlined_call_operand.vmem [shape: bf16[10,32], index: 7, kind: output, shape index: {}]  }
   0x1   :  { %v27_v0 = vld [vmem:[%s364_s0] sm:$0xf]  ;;  %v28_v2 = vld [vmem:[%s364_s0 + $0x4] sm:$0x1]  ;;  %256 = vrcp.f32 %v266_v6  ;;  %v246_v23 = vld [vmem:[%s368_s3 + $0x8] sm:$0xff]  ;;  %vm211_vm10 = vcmask 257024  }
   0x2   :  { %v310_v1 = vunpack.c.l.bf16 %v27_v0  ;;  %v317_v4 = vunpack.c.l.bf16 %v28_v2  ;;  %126 = vmatpush.bf16.msra.mxu0 %v246_v23  ;;  %v245_v25 = vld [vmem:[%s368_s3] sm:$0xff]  ;;  %v250_v54 = vld [vmem:[%s370_s5 + $0x18] sm:$0xff]  ;;  %v249_v55 = vld [vmem:[%s370_s5 + $0x10] sm:$0xff]  ;;  %vm213_vm11 = vcmask 253952  }
   0x3   :  { %v252_v44 = vld [vmem:[%s365_s1] ss:$0 sm:$0xff]  ;;  %197 = vmatpush.bf16.msra.mxu1 %v250_v54  ;;  %v248_v56 = vld [vmem:[%s370_s5 + $0x8] sm:$0xff] }
   0x4   :  { %v34_v3 = vsel %vm33_vm0, %v310_v1, 0.0  ;;  %v38_v5 = vsel %vm37_vm1, %v317_v4, 0.0  ;;  %v253_v49 = vld [vmem:[%s366_s2] ss:$0 sm:$0xff] }
   0x5   :  { %35 = vadd.xlane.f32.xlu0 %v34_v3  ;;  %v247_v57 = vld [vmem:[%s370_s5] sm:$0xff] }
   0x6   :  { %127 = vmatpush.bf16.msra.mxu0 %v245_v25  ;;  %v254_v58 = vld [vmem:[%s367_s4] ss:$0 sm:$0xff] }
   0x7   :  { %v257_v7 = vpop.eup %256  ;;  %198 = vmatpush.bf16.msra.mxu1 %v249_v55 }
   0x8   :  { %v42_v8 = vmul.f32 32.0, %v257_v7  ;;  %vm46_vm2 = vweird.f32 %v257_v7 }
   0xa   :  { %v43_v9 = vsub.f32 1.0, %v42_v8 }
   0xb   :  { %199 = vmatpush.bf16.msra.mxu1 %v248_v56 }
   0xc   :  { %v44_v10 = vmul.f32 %v257_v7, %v43_v9 }
   0xd   :  { %39 = vadd.xlane.f32.xlu0 %v38_v5 }
   0xe   :  { %v45_v11 = vadd.f32 %v257_v7, %v44_v10 }
   0xf   :  { %200 = vmatpush.bf16.msra.mxu1 %v247_v57 }
  0x10   :  { %v47_v12 = vsel %vm46_vm2, %v257_v7, %v45_v11 }
  0x78   :  { %v36_v13 = vpop.xlane.xlu0 %35 }
  0x79   :  { %v48_v14 = vmul.f32 %v47_v12, %v36_v13 }
  0x7b   :  { %v50_v15 = vsub.f32 %v310_v1, %v48_v14 }
  0x7d   :  { %v52_v16 = vmul.f32 %v50_v15, %v50_v15 }
  0x7f   :  { %v54_v17 = vsel %vm33_vm0, %v52_v16, 0.0 }
  0x80   :  { %55 = vadd.xlane.f32.xlu1 %v54_v17  ;;  %v40_v18 = vpop.xlane.xlu0 %39 }
  0x81   :  { %v49_v19 = vmul.f32 %v47_v12, %v40_v18 }
  0x83   :  { %v51_v20 = vsub.f32 %v317_v4, %v49_v19 }
  0x85   :  { %v53_v21 = vmul.f32 %v51_v20, %v51_v20 }
  0x87   :  { %v57_v22 = vsel %vm37_vm1, %v53_v21, 0.0 }
  0x88   :  { %58 = vadd.xlane.f32.xlu1 %v57_v22 }
  0xf3   :  { %v56_v24 = vpop.xlane.xlu1 %55 }
  0xf4   :  { %v60_v26 = vmul.f32 %v56_v24, %v47_v12 }
  0xf6   :  { %v62_v27 = vadd.f32 1e-12, %v60_v26 }
  0xf8   :  { %258 = vrsqrt.f32 %v62_v27  ;;  %vm70_vm4 = vweird.f32 %v62_v27 }
  0xfb   :  { %v59_v28 = vpop.xlane.xlu1 %58 }
  0xfc   :  { %v61_v29 = vmul.f32 %v59_v28, %v47_v12 }
  0xfe   :  { %v259_v30 = vpop.eup %258  ;;  %v63_v31 = vadd.f32 1e-12, %v61_v29 }
  0xff   :  { %v65_v32 = vmul.f32 %v259_v30, %v62_v27  ;;  %vm71_vm3 = vweird.f32 %v259_v30 }
 0x100   :  { %260 = vrsqrt.f32 %v63_v31  ;;  %vm72_vm5 = vmor %vm70_vm4, %vm71_vm3  ;;  %vm80_vm7 = vweird.f32 %v63_v31 }
 0x101   :  { %v66_v33 = vmul.f32 %v259_v30, %v65_v32 }
 0x103   :  { %v67_v34 = vmul.f32 0.5, %v66_v33 }
 0x105   :  { %v68_v35 = vsub.f32 1.5, %v67_v34 }
 0x106   :  { %v261_v36 = vpop.eup %260 }
 0x107   :  { %v69_v37 = vmul.f32 %v259_v30, %v68_v35  ;;  %v75_v38 = vmul.f32 %v261_v36, %v63_v31  ;;  %vm81_vm6 = vweird.f32 %v261_v36 }
 0x108   :  { %vm82_vm8 = vmor %vm80_vm7, %vm81_vm6 }
 0x109   :  { %v76_v39 = vmul.f32 %v261_v36, %v75_v38  ;;  %v73_v40 = vsel %vm72_vm5, %v259_v30, %v69_v37 }
 0x10a   :  { %v84_v43 = vmul.f32 %v73_v40, %v50_v15 }
 0x10b   :  { %v77_v41 = vmul.f32 0.5, %v76_v39 }
 0x10c   :  { %v89_v48 = vmul.f32 %v252_v44, %v84_v43 }
 0x10d   :  { %v78_v42 = vsub.f32 1.5, %v77_v41 }
 0x10e   :  { %v94_v51 = vadd.f32 %v253_v49, %v89_v48 }
 0x10f   :  { %v79_v45 = vmul.f32 %v261_v36, %v78_v42 }
 0x111   :  { %v83_v46 = vsel %vm82_vm8, %v261_v36, %v79_v45 }
 0x112   :  { %v85_v47 = vmul.f32 %v83_v46, %v51_v20  ;;  %v255_v20 = vld [vmem:[%s369_s6] ss:$0 sm:$0xff] }
 0x114   :  { %v90_v50 = vmul.f32 %v252_v44, %v85_v47 }
 0x116   :  { %v95_v52 = vadd.f32 %v253_v49, %v90_v50 }
 0x118   :  { %v96_v53 = vpack.c.bf16 %v95_v52, %v94_v51 }
 0x11a   :  { %227 = vmatmul.msk.bf16.vlgmr.msra.gmra.mxu0 %vm33_vm0, %v96_v53 }
 0x197   :  { %v129_v59 = vpop.f32.mrf.mxu0 }
 0x198   :  { %v130_v60 = vadd.f32 %v254_v58, %v129_v59 }
 0x19a   :  { %v136_v61 = vmul.f32 0.044715, %v130_v60  ;;  %v134_v14 = vmul.f32 0.5, %v130_v60 }
 0x19c   :  { %v138_v62 = vmul.f32 %v136_v61, %v130_v60 }
 0x19e   :  { %v140_v63 = vmul.f32 %v138_v62, %v130_v60 }
 0x19f   :  { %v131_v0 = vpop.f32.mrf.mxu0 }
 0x1a0   :  { %v132_v2 = vadd.f32 %v254_v58, %v131_v0  ;;  %v142_v3 = vadd.f32 %v140_v63, %v130_v60 }
 0x1a2   :  { %v137_v5 = vmul.f32 0.044715, %v132_v2  ;;  %v144_v7 = vmul.f32 0.7978846, %v142_v3  ;;  %v135_v15 = vmul.f32 0.5, %v132_v2 }
 0x1a4   :  { %v139_v6 = vmul.f32 %v137_v5, %v132_v2  ;;  %262 = vtanh.f32 %v144_v7 }
 0x1a6   :  { %v141_v8 = vmul.f32 %v139_v6, %v132_v2 }
 0x1a8   :  { %v143_v9 = vadd.f32 %v141_v8, %v132_v2 }
 0x1aa   :  { %v145_v10 = vmul.f32 0.7978846, %v143_v9  ;;  %v263_v11 = vpop.eup %262 }
 0x1ab   :  { %v148_v12 = vadd.f32 1.0, %v263_v11 }
 0x1ac   :  { %264 = vtanh.f32 %v145_v10 }
 0x1ad   :  { %v150_v17 = vmul.f32 %v148_v12, %v134_v14 }
 0x1b2   :  { %v265_v13 = vpop.eup %264 }
 0x1b3   :  { %v149_v16 = vadd.f32 1.0, %v265_v13 }
 0x1b5   :  { %v151_v18 = vmul.f32 %v149_v16, %v135_v15 }
 0x1b7   :  { %v152_v19 = vpack.c.bf16 %v151_v18, %v150_v17 }
 0x1b9   :  { %244 = vmatmul.msk.bf16.vlgmr.msra.gmra.mxu1 %vm189_vm9, %v152_v19 }
 0x236   :  { %v202_v21 = vpop.f32.mrf.mxu1 }
 0x237   :  { %v203_v22 = vadd.f32 %v255_v20, %v202_v21 }
 0x239   :  { %v207_v23 = vadd.f32 %v203_v22, %v310_v1 }
 0x23b   :  { %v209_v24 = vpack.c.bf16 %v207_v23, %v207_v23 }
 0x23d   :  { %212 = vst.msk [vmem:[%s371_s7] sm:$0xf] %vm211_vm10, %v209_v24 }
 0x23e   :  { %v204_v25 = vpop.f32.mrf.mxu1 }
 0x23f   :  { %v205_v26 = vadd.f32 %v255_v20, %v204_v25 }
 0x241   :  { %v208_v27 = vadd.f32 %v205_v26, %v317_v4 }
 0x243   :  { %v210_v28 = vpack.c.bf16 %v208_v27, %v208_v27 }
 0x245   :  { %214 = vst.msk [vmem:[%s371_s7 + $0x4] sm:$0x1] %vm213_vm11, %v210_v28 }

// kernel: image_encoder_forward.8
= control target key start
LH: loop header
LB: loop body
LE: loop exit
PB: predicated region body
PF: predicated region fallthrough
CT: control target
= control target key end

     0   :  { %s635_s15 = smov 0   ;;  %s637_s16 = smov 0   ;;  %s714_s0 = inlined_call_operand.vmem [shape: f32[2,4,192], index: 0, kind: input, shape index: {}]   ;;  %s715_s1 = inlined_call_operand.vmem [shape: bf16[192,32], index: 1, kind: input, shape index: {}]   ;;  %s716_s2 = inlined_call_operand.vmem [shape: f32[1,32], index: 2, kind: input, shape index: {}]   ;;  %s717_s3 = inlined_call_operand.vmem [shape: f32[1,4,32], index: 3, kind: input, shape index: {}]   ;;  %s718_s4 = inlined_call_operand.vmem [shape: bf16[2,4,32], index: 4, kind: output, shape index: {}]  }
   0x1   :  { %s639_s17 = smov 0  }
   0x2 LB: > { %s26_s18 = sadd.s32 1, %s604_s16  ;;  %p493_p0 = scmp.ge.s32.totalorder %s608_s17, 1  ;;  %s608_s17 = sphi %s639_s17, %s14_s17   ;;  %s604_s16 = sphi %s637_s16, %s720_s16   ;;  %s600_s15 = sphi %s635_s15, %s719_s15  }
   0x3   : > { %p28_p1 = scmp.ge.s32.totalorder %s26_s18, 2  ;;  %p191_p2 = scmp.lt.s32.totalorder %s608_s17, 3 }
   0x5   : > { %s722_s18 = smov (%p28_p1, %s26_s18), 0  ;;  %p192_p3 = pnand %p493_p0, %p191_p2 }
   0x6   : > { %p227_p4 = scmp.lt.s32.totalorder (!%p192_p3), %s600_s15, 1 }
   0x7   : > { %195 = sbr.rel (%p192_p3) target bundleno = 179 (0xb3), region = 36 }
   0xc   : > { %v556_v0 = vld [vmem:[%s715_s1 + $0x38] sm:$0xff]  ;;  %v555_v2 = vld [vmem:[%s715_s1 + $0x30] sm:$0xff]  ;;  %s724_s15 = smov (!%p227_p4, %s600_s15), 1  ;;  %v554_v4 = vld [vmem:[%s715_s1 + $0x28] sm:$0xff]  ;;  %vm357_vm0 = vcmask 523264   ;;  %vm390_vm1 = vcmask 254976  }
   0xd   : > { %v560_v1 = vld [vmem:[%s715_s1 + $0x58] sm:$0xff]  ;;  %361 = vmatpush.bf16.msra.mxu0 %v556_v0  ;;  %v559_v3 = vld [vmem:[%s715_s1 + $0x50] sm:$0xff]  ;;  %s548_s27 = sshll.u32 %s724_s15, 3  ;;  %v558_v6 = vld [vmem:[%s715_s1 + $0x48] sm:$0xff]  ;;  %s496_s29 = sshll.u32 %s724_s15, 1 }
   0xe   : > { %378 = vmatpush.bf16.msra.mxu1 %v560_v1  ;;  %s235_s30 = scalar_lea.vmem %s714_s0, %s548_s27  ;;  %v553_v7 = vld [vmem:[%s715_s1 + $0x20] sm:$0xff]  ;;  %v552_v9 = vld [vmem:[%s715_s1 + $0x18] sm:$0xff]  ;;  %v551_v12 = vld [vmem:[%s715_s1 + $0x10] sm:$0xff]  ;;  %s246_s6 = scalar_lea.vmem %s718_s4, %s496_s29 }
   0xf   : > { %v248_v5 = vld [vmem:[%s235_s30] sm:$0xff]  ;;  %v550_v13 = vld [vmem:[%s715_s1 + $0x8] sm:$0xff] }
  0x10   : > { %250 = vst [vmem:[#allocation1] ss:$2 sm:$0xff] %v248_v5  ;;  %v557_v8 = vld [vmem:[%s715_s1 + $0x40] sm:$0xff] }
  0x11   : > { %362 = vmatpush.bf16.msra.mxu0 %v555_v2  ;;  %v549_v14 = vld [vmem:[%s715_s1] sm:$0xff] }
  0x12   : > { %379 = vmatpush.bf16.msra.mxu1 %v559_v3  ;;  %v585_v19 = vld [vmem:[%s716_s2] ss:$0 sm:$0xff] }
  0x13   : > { %v387_v22 = vld [vmem:[%s717_s3] sm:$0xf] }
  0x15   : > { %363 = vmatpush.bf16.msra.mxu0 %v554_v4 }
  0x16   : > { %380 = vmatpush.bf16.msra.mxu1 %v558_v6 }
  0x17   : > { %v252_v10 = vld.sshfl [vmem:[#allocation1 + $0x8] sm:$0xff pattern:$0x75316420]  ;;  %v251_v15 = vld.sshfl [vmem:[#allocation1] sm:$0xff pattern:$0x75316420] }
  0x18   : > { %v256_v11 = vpack.c.bf16 %v252_v10, %v252_v10  ;;  %v255_v16 = vpack.c.bf16 %v251_v15, %v251_v15 }
  0x19   : > { %364 = vmatpush.bf16.msra.mxu0 %v553_v7 }
  0x1a   : > { %381 = vmatpush.bf16.msra.mxu1 %v557_v8 }
  0x1d   : > { %365 = vmatpush.bf16.msra.mxu0 %v552_v9  ;;  %545 = vmatmul.msk.bf16.vlgmr.msra.gmra.mxu1 %vm357_vm0, %v256_v11 }
  0x21   : > { %366 = vmatpush.bf16.msra.mxu0 %v551_v12 }
  0x25   : > { %367 = vmatpush.bf16.msra.mxu0 %v550_v13 }
  0x29   : > { %368 = vmatpush.bf16.msra.mxu0 %v549_v14 }
  0x2c   : > { %369 = vmatmul.bf16.vlgmr.msra.gmra.mxu0 %v255_v16 }
  0x9a   : > { %v383_v17 = vpop.f32.mrf.mxu1 }
  0xa2   : > { %v385_v18 = vpop.f32.mrf.mxu1 }
  0xa9   : > { %v370_v20 = vpop.f32.mrf.mxu0 }
  0xaa   : > { %v371_v21 = vadd.f32 %v585_v19, %v370_v20 }
  0xac   : > { %v384_v23 = vadd.f32 %v383_v17, %v371_v21 }
  0xae   : > { %v388_v24 = vadd.f32 %v387_v22, %v384_v23 }
  0xb0   : > { %v389_v25 = vpack.c.bf16 %v388_v24, %v388_v24 }
  0xb1   : > { %v372_v26 = vpop.f32.mrf.mxu0 }
  0xb2   : > { %391 = vst.msk [vmem:[%s246_s6] sm:$0x3] %vm390_vm1, %v389_v25 }
  0xb3 PF: > { %s14_s17 = sadd.s32 1, %s608_s17   ;;  %s719_s15 = smov %s604_s16 }
  0xb4   : > { %p11_p5 = scmp.ge.s32.totalorder %s14_s17, 4   ;;  %s720_s16 = smov %s722_s18 }
  0xb6   :  { %13 = sbr.rel (!%p11_p5) target bundleno = 2 (0x2), region = 69 }

// kernel: image_encoder_forward.10
= control target key start
LH: loop header
LB: loop body
LE: loop exit
PB: predicated region body
PF: predicated region fallthrough
CT: control target
= control target key end

     0   :  { %s789_s15 = smov 0   ;;  %s887_s0 = inlined_call_operand.vmem [shape: bf16[2,5,96], index: 0, kind: input, shape index: {}]   ;;  %s888_s1 = inlined_call_operand.vmem [shape: bf16[32,32], index: 1, kind: input, shape index: {}]   ;;  %s889_s2 = inlined_call_operand.vmem [shape: f32[1,32], index: 2, kind: input, shape index: {}]   ;;  %s890_s3 = inlined_call_operand.vmem [shape: bf16[2,5,32], index: 3, kind: input, shape index: {}]   ;;  %s891_s4 = inlined_call_operand.vmem [shape: bf16[2,5,32], index: 4, kind: output, shape index: {}]  }
   0x1 LB: > { %s685_s16 = sadd.s32 4294967295, %s750_s15   ;;  %p689_p0 = scmp.ge.s32.totalorder %s750_s15, 1  ;;  %s750_s15 = sphi %s789_s15, %s14_s15  }
   0x2   : > { %p170_p1 = scmp.lt.s32.totalorder %s750_s15, 3 }
   0x4   : > { %p171_p2 = pnand %p689_p0, %p170_p1 }
   0x5   : > { %p198_p3 = scmp.lt.s32.totalorder (!%p171_p2), %s685_s16, 1  ;;  %s752_s21 = smov (!%p171_p2), 96  }
   0x6   : > { %174 = sbr.rel (%p171_p2) target bundleno = 1372 (0x55c), region = 36  ;;  %s753_s22 = smov (!%p171_p2), 120  }
   0x7   : > { %s754_s23 = smov (!%p171_p2), 88   ;;  %s755_s24 = smov (!%p171_p2), 64  }
   0x8   : > { %s756_s25 = smov (!%p171_p2), 56   ;;  %s757_s26 = smov (!%p171_p2), 80  }
   0x9   : > { %s758_s27 = smov (!%p171_p2), 112   ;;  %s760_s28 = smov (!%p171_p2), 72  }
   0xa   : > { %s761_s29 = smov (!%p171_p2), 104   ;;  %s762_s8 = smov (!%p171_p2), 40  }
   0xb   : > { %s893_s16 = smov (!%p198_p3, %s685_s16), 1  ;;  %vm217_vm0 = vcmask 64512   ;;  %vm237_vm1 = vcmask 36864   ;;  %vm269_vm2 = vcmask 1041408   ;;  %vm270_vm3 = vcmask 1042432   ;;  %s763_s9 = smov 48  }
   0xc   : > { %s797_s17 = sshll.u32 %s893_s16, 2  ;;  %v759_v31 = vmov 65535   ;;  %vm265_vm8 = vcmask 39936   ;;  %vm294_vm13 = vcmask 1043456   ;;  %vm311_vm14 = vcmask 258048  }
   0xd   : > { %s803_s20 = scalar_lea.vmem %s887_s0, %s797_s17  ;;  %v271_v32 = vsel %vm269_vm2, 4294967295, %v759_v31  ;;  %s205_s18 = scalar_lea.vmem %s890_s3, %s797_s17 }
   0xe   : > { %v211_v0 = vld [vmem:[%s803_s20] sm:$0x7]  ;;  %v823_v33 = vsel %vm270_vm3, %v271_v32, 0 }
   0xf   : > { %v313_v1 = vld [vmem:[%s803_s20] sm:$0x7]  ;;  %v213_v2 = vunpack.c.l.b16 %v211_v0 }
  0x10   : > { %v315_v3 = vunpack.c.l.b16 %v313_v1  ;;  %v410_v27 = vld [vmem:[%s803_s20] sm:$0x7] }
  0x11   : > { %v214_v4 = vpack.c.b16 %v213_v2, %v213_v2  ;;  %v412_v28 = vunpack.c.l.b16 %v410_v27  ;;  %v507_v34 = vld [vmem:[%s803_s20] sm:$0x7] }
  0x12   : > { %v316_v5 = vpack.c.b16 %v315_v3, %v315_v3  ;;  %v509_v36 = vunpack.c.l.b16 %v507_v34 }
  0x13   : > { %215 = vrot.lane.b32.xlu0 %v214_v4, %s752_s21  ;;  %v819_v29 = vpack.c.b16 %v412_v28, %v412_v28 }
  0x14   : > { %317 = vrot.lane.b32.xlu1 %v316_v5, %s753_s22  ;;  %v827_v40 = vpack.c.b16 %v509_v36, %v509_v36 }
  0x1b   : > { %319 = vrot.lane.b32.xlu0 %v316_v5, %s754_s23  ;;  %s209_s23 = scalar_lea.vmem %s891_s4, %s797_s17 }
  0x85   : > { %v216_v6 = vpop.permute.xlu0 %215 }
  0x86   : > { %v222_v7 = vsel %vm217_vm0, %v216_v6, 0  ;;  %v318_v10 = vpop.permute.xlu1 %317 }
  0x87   : > { %231 = vmatpush.bf16.xpose.msra.mxu0 %v222_v7  ;;  %v387_v7 = vld [vmem:[%s888_s1 + $0x4] sm:$0xf] }
  0x8d   : > { %v320_v8 = vpop.permute.xlu0 %319 }
  0x8e   : > { %693 = vmatmul.msk.bf16.vlgmr.msra.gmra.mxu0 %vm217_vm0, %v211_v0  ;;  %v325_v9 = vsel %vm217_vm0, %v320_v8, 0  ;;  %v392_v8 = vsel %vm294_vm13, %v387_v7, 0 }
  0x8f   : > { %334 = vmatpush.bf16.xpose.msra.mxu3 %v325_v9 }
  0x96   : > { %696 = vmatmul.msk.bf16.vlgmr.msra.gmra.mxu3 %vm217_vm0, %v318_v10 }
 0x10b   : > { %v233_v11 = vpop.f32.mrf.mxu0 }
 0x10c   : > { %v238_v12 = vsel %vm237_vm1, %v233_v11, -inf }
 0x10d   : > { %239 = vmax.xlane.f32.xlu1 %v238_v12 }
 0x113   : > { %v235_v13 = vpop.f32.mrf.mxu0 }
 0x119   : > { %v336_v14 = vpop.f32.mrf.mxu3 }
 0x11a   : > { %v340_v15 = vsel %vm237_vm1, %v336_v14, -inf }
 0x11b   : > { %341 = vmax.xlane.f32.xlu2 %v340_v15 }
 0x121   : > { %v338_v16 = vpop.f32.mrf.mxu3 }
 0x126   : > { %513 = vrot.lane.b32.xlu1 %v827_v40, %s760_s28 }
 0x180   : > { %v240_v17 = vpop.xlane.xlu1 %239 }
 0x181   : > { %v241_v18 = vsub.f32 %v233_v11, %v240_v17 }
 0x183   : > { %v242_v19 = vmul.f32 1.442695, %v241_v18 }
 0x185   : > { %728 = vpow2.f32 %v242_v19 }
 0x18b   : > { %v729_v20 = vpop.eup %728 }
 0x18c   : > { %v244_v21 = vsel %vm237_vm1, %v729_v20, 0.0 }
 0x18d   : > { %245 = vadd.xlane.f32.xlu2 %v244_v21 }
 0x18e   : > { %v342_v22 = vpop.xlane.xlu2 %341 }
 0x18f   : > { %v343_v23 = vsub.f32 %v336_v14, %v342_v22 }
 0x191   : > { %v344_v24 = vmul.f32 1.442695, %v343_v23 }
 0x193   : > { %730 = vpow2.f32 %v344_v24 }
 0x198   : > { %v514_v9 = vpop.permute.xlu1 %513 }
 0x199   : > { %v814_v25 = vpop.eup %730  ;;  %v519_v12 = vsel %vm217_vm0, %v514_v9, 0 }
 0x19a   : > { %v346_v26 = vsel %vm237_vm1, %v814_v25, 0.0 }
 0x19b   : > { %347 = vadd.xlane.f32.xlu0 %v346_v26 }
 0x1a5   : > { %263 = vrot.lane.b32.xlu2 %v214_v4, %s755_s24 }
 0x1ad   : > { %365 = vrot.lane.b32.xlu2 %v316_v5, %s756_s25  ;;  %v290_v5 = vld [vmem:[%s888_s1] sm:$0xf] }
 0x1ae   : > { %v296_v6 = vsel %vm294_vm13, %v290_v5, 0 }
 0x1af   : > { %511 = vrot.lane.b32.xlu0 %v827_v40, %s761_s29  ;;  %305 = vmatpush.bf16.msra.mxu2 %v296_v6 }
 0x1b3   : > { %401 = vmatpush.bf16.msrb.mxu2 %v392_v8  ;;  %v581_v8 = vld [vmem:[%s888_s1 + $0xc] sm:$0xf] }
 0x1b4   : > { %v586_v9 = vsel %vm294_vm13, %v581_v8, 0 }
 0x1b5   : > { %416 = vrot.lane.b32.xlu2 %v819_v29, %s757_s26 }
 0x1bd   : > { %414 = vrot.lane.b32.xlu2 %v819_v29, %s758_s27 }
 0x200   : > { %v246_v30 = vpop.xlane.xlu2 %245 }
 0x201   : > { %732 = vrcp.f32 %v246_v30  ;;  %v258_v42 = vand.u32 2147483648, %v246_v30  ;;  %v256_v44 = vand.u32 2147483647, %v246_v30  ;;  %vm252_vm5 = vweird.f32 %v246_v30 }
 0x203   : > { %v259_v47 = vor.u32 1.1754944e-38, %v258_v42  ;;  %vm257_vm7 = vcmp.eq.f32.partialorder %v256_v44, 8.507059e+37 }
 0x207   : > { %v733_v35 = vpop.eup %732 }
 0x208   : > { %v248_v37 = vmul.f32 %v733_v35, %v246_v30  ;;  %v264_v38 = vpop.permute.xlu2 %263  ;;  %vm253_vm4 = vweird.f32 %v733_v35 }
 0x209   : > { %v274_v39 = vand.u32 %v823_v33, %v264_v38  ;;  %vm254_vm6 = vmor %vm252_vm5, %vm253_vm4 }
 0x20a   : > { %v249_v41 = vsub.f32 1.0, %v248_v37 }
 0x20b   : > { %283 = vmatpush.bf16.msra.mxu1 %v274_v39 }
 0x20c   : > { %v250_v43 = vmul.f32 %v733_v35, %v249_v41 }
 0x20e   : > { %v348_v45 = vpop.xlane.xlu0 %347  ;;  %v251_v46 = vadd.f32 %v733_v35, %v250_v43 }
 0x20f   : > { %734 = vrcp.f32 %v348_v45  ;;  %v360_v58 = vand.u32 2147483648, %v348_v45  ;;  %v358_v61 = vand.u32 2147483647, %v348_v45  ;;  %vm354_vm10 = vweird.f32 %v348_v45 }
 0x210   : > { %v366_v48 = vpop.permute.xlu2 %365  ;;  %v255_v49 = vsel %vm254_vm6, %v733_v35, %v251_v46 }
 0x211   : > { %v371_v50 = vand.u32 %v366_v48, %v823_v33  ;;  %v260_v51 = vsel %vm257_vm7, %v259_v47, %v255_v49  ;;  %v361_v63 = vor.u32 1.1754944e-38, %v360_v58  ;;  %vm359_vm12 = vcmp.eq.f32.partialorder %v358_v61, 8.507059e+37 }
 0x212   : > { %v261_v52 = vmul.f32 %v729_v20, %v260_v51 }
 0x213   : > { %380 = vmatpush.bf16.msrb.mxu1 %v371_v50 }
 0x214   : > { %v262_v53 = vpack.c.bf16 %v261_v52, %v261_v52 }
 0x215   : > { %v735_v54 = vpop.eup %734 }
 0x216   : > { %v350_v55 = vmul.f32 %v735_v54, %v348_v45  ;;  %694 = vmatmul.msk.bf16.vlgmr.msra.gmra.mxu1 %vm265_vm8, %v262_v53  ;;  %vm355_vm9 = vweird.f32 %v735_v54 }
 0x217   : > { %vm356_vm11 = vmor %vm354_vm10, %vm355_vm9 }
 0x218   : > { %v351_v56 = vsub.f32 1.0, %v350_v55  ;;  %v417_v57 = vpop.permute.xlu2 %416 }
 0x219   : > { %v422_v59 = vsel %vm217_vm0, %v417_v57, 0 }
 0x21a   : > { %v352_v60 = vmul.f32 %v735_v54, %v351_v56  ;;  %431 = vmatpush.bf16.xpose.msrb.mxu0 %v422_v59 }
 0x21c   : > { %v353_v62 = vadd.f32 %v735_v54, %v352_v60 }
 0x21e   : > { %v357_v0 = vsel %vm356_vm11, %v735_v54, %v353_v62 }
 0x21f   : > { %v362_v1 = vsel %vm359_vm12, %v361_v63, %v357_v0 }
 0x220   : > { %v415_v2 = vpop.permute.xlu2 %414  ;;  %v363_v3 = vmul.f32 %v814_v25, %v362_v1 }
 0x221   : > { %699 = vmatmul.msk.bf16.vlgmr.msrb.gmra.mxu0 %vm217_vm0, %v415_v2  ;;  %v512_v20 = vpop.permute.xlu0 %511 }
 0x222   : > { %v364_v4 = vpack.c.bf16 %v363_v3, %v363_v3 }
 0x226   : > { %697 = vmatmul.msk.bf16.vlgmr.msrb.gmra.mxu1 %vm265_vm8, %v364_v4 }
 0x293   : > { %v285_v10 = vpop.f32.mrf.mxu1 }
 0x294   : > { %v289_v11 = vpack.c.bf16 %v285_v10, %v285_v10 }
 0x296   : > { %695 = vmatmul.msk.bf16.vlgmr.msra.gmra.mxu2 %vm217_vm0, %v289_v11 }
 0x297   : > { %528 = vmatpush.bf16.xpose.msra.mxu2 %v519_v12 }
 0x29b   : > { %v287_v13 = vpop.f32.mrf.mxu1 }
 0x29e   : > { %v433_v14 = vpop.f32.mrf.mxu0 }
 0x29f   : > { %v437_v15 = vsel %vm237_vm1, %v433_v14, -inf }
 0x2a0   : > { %438 = vmax.xlane.f32.xlu2 %v437_v15 }
 0x2a3   : > { %v382_v16 = vpop.f32.mrf.mxu1 }
 0x2a4   : > { %v386_v17 = vpack.c.bf16 %v382_v16, %v382_v16 }
 0x2a6   : > { %698 = vmatmul.msk.bf16.vlgmr.msrb.gmra.mxu2 %vm217_vm0, %v386_v17  ;;  %v435_v18 = vpop.f32.mrf.mxu0 }
 0x2ab   : > { %v384_v19 = vpop.f32.mrf.mxu1 }
 0x2b6   : > { %702 = vmatmul.msk.bf16.vlgmr.msra.gmra.mxu2 %vm217_vm0, %v512_v20 }
 0x313   : > { %v439_v21 = vpop.xlane.xlu2 %438 }
 0x314   : > { %v440_v22 = vsub.f32 %v433_v14, %v439_v21 }
 0x316   : > { %v441_v23 = vmul.f32 1.442695, %v440_v22 }
 0x318   : > { %736 = vpow2.f32 %v441_v23  ;;  %v610_v23 = vld [vmem:[%s205_s18] sm:$0x7] }
 0x319   : > { %v307_v24 = vpop.f32.mrf.mxu2 }
 0x31a   : > { %312 = vst.msk [vmem:[#allocation2] sm:$0x1f] %vm311_vm14, %v307_v24 }
 0x31e   : > { %v737_v25 = vpop.eup %736 }
 0x31f   : > { %v443_v26 = vsel %vm237_vm1, %v737_v25, 0.0 }
 0x320   : > { %444 = vadd.xlane.f32.xlu0 %v443_v26  ;;  %v611_v26 = vunpack.c.l.bf16 %v610_v23 }
 0x321   : > { %v309_v27 = vpop.f32.mrf.mxu2  ;;  %v407_v30 = vld [vmem:[#allocation2] sm:$0x1f] }
 0x329   : > { %v403_v28 = vpop.f32.mrf.mxu2 }
 0x32a   : > { %v408_v31 = vadd.f32 %v407_v30, %v403_v28 }
 0x32c   : > { %409 = vst.msk [vmem:[#allocation2] sm:$0x1f] %vm311_vm14, %v408_v31  ;;  %v617_v31 = vld [vmem:[%s209_s23] sm:$0x7] }
 0x331   : > { %v405_v32 = vpop.f32.mrf.mxu2 }
 0x333   : > { %v504_v17 = vld [vmem:[#allocation2] sm:$0x1f] }
 0x339   : > { %v530_v34 = vpop.f32.mrf.mxu2 }
 0x33a   : > { %v534_v35 = vsel %vm237_vm1, %v530_v34, -inf }
 0x33b   : > { %535 = vmax.xlane.f32.xlu1 %v534_v35 }
 0x341   : > { %v532_v36 = vpop.f32.mrf.mxu2 }
 0x354   : > { %559 = vrot.lane.b32.xlu1 %v827_v40, %s762_s8 }
 0x393   : > { %v445_v43 = vpop.xlane.xlu0 %444 }
 0x394   : > { %vm451_vm15 = vweird.f32 %v445_v43  ;;  %v457_v49 = vand.u32 2147483648, %v445_v43  ;;  %v455_v51 = vand.u32 2147483647, %v445_v43 }
 0x396   : > { %v458_v53 = vor.u32 1.1754944e-38, %v457_v49  ;;  %vm456_vm3 = vcmp.eq.f32.partialorder %v455_v51, 8.507059e+37 }
 0x3ae   : > { %v536_v37 = vpop.xlane.xlu1 %535 }
 0x3af   : > { %v537_v38 = vsub.f32 %v530_v34, %v536_v37 }
 0x3b1   : > { %v538_v39 = vmul.f32 1.442695, %v537_v38 }
 0x3b3   : > { %738 = vpow2.f32 %v538_v39 }
 0x3b4   : > { %740 = vrcp.f32 %v445_v43 }
 0x3b9   : > { %v739_v41 = vpop.eup %738 }
 0x3ba   : > { %v540_v42 = vsel %vm237_vm1, %v739_v41, 0.0  ;;  %v741_v44 = vpop.eup %740 }
 0x3bb   : > { %541 = vadd.xlane.f32.xlu2 %v540_v42  ;;  %v447_v47 = vmul.f32 %v741_v44, %v445_v43  ;;  %vm452_vm2 = vweird.f32 %v741_v44 }
 0x3bc   : > { %vm453_vm1 = vmor %vm451_vm15, %vm452_vm2 }
 0x3bd   : > { %v448_v40 = vsub.f32 1.0, %v447_v47 }
 0x3bf   : > { %v449_v48 = vmul.f32 %v741_v44, %v448_v40 }
 0x3c1   : > { %v450_v50 = vadd.f32 %v741_v44, %v449_v48 }
 0x3c6   : > { %v560_v45 = vpop.permute.xlu1 %559 }
 0x3c7   : > { %v565_v46 = vand.u32 %v560_v45, %v823_v33 }
 0x3c9   : > { %574 = vmatpush.bf16.msra.mxu0 %v565_v46 }
 0x3d3   : > { %462 = vrot.lane.b32.xlu2 %v819_v29, %s763_s9  ;;  %v454_v29 = vsel %vm453_vm1, %v741_v44, %v450_v50 }
 0x3d4   : > { %v459_v54 = vsel %vm456_vm3, %v458_v53, %v454_v29 }
 0x3d5   : > { %v460_v58 = vmul.f32 %v737_v25, %v459_v54  ;;  %v727_v25 = vld [vmem:[%s889_s2] ss:$0 sm:$0xff] }
 0x3d7   : > { %v461_v0 = vpack.c.bf16 %v460_v58, %v460_v58 }
 0x42e   : > { %v542_v52 = vpop.xlane.xlu2 %541 }
 0x42f   : > { %742 = vrcp.f32 %v542_v52  ;;  %v554_v61 = vand.u32 2147483648, %v542_v52  ;;  %v552_v63 = vand.u32 2147483647, %v542_v52  ;;  %vm548_vm5 = vweird.f32 %v542_v52 }
 0x431   : > { %v555_v2 = vor.u32 1.1754944e-38, %v554_v61  ;;  %vm553_vm7 = vcmp.eq.f32.partialorder %v552_v63, 8.507059e+37 }
 0x435   : > { %v743_v55 = vpop.eup %742 }
 0x436   : > { %v544_v56 = vmul.f32 %v743_v55, %v542_v52  ;;  %v463_v57 = vpop.permute.xlu2 %462  ;;  %vm549_vm4 = vweird.f32 %v743_v55 }
 0x437   : > { %v468_v59 = vand.u32 %v463_v57, %v823_v33  ;;  %vm550_vm6 = vmor %vm548_vm5, %vm549_vm4  ;;  %v484_v33 = vld [vmem:[%s888_s1 + $0x8] sm:$0xf] }
 0x438   : > { %v545_v60 = vsub.f32 1.0, %v544_v56  ;;  %v489_v7 = vsel %vm294_vm13, %v484_v33, 0 }
 0x439   : > { %477 = vmatpush.bf16.msrb.mxu3 %v468_v59  ;;  %498 = vmatpush.bf16.msra.mxu1 %v489_v7 }
 0x43a   : > { %v546_v62 = vmul.f32 %v743_v55, %v545_v60 }
 0x43c   : > { %v547_v1 = vadd.f32 %v743_v55, %v546_v62  ;;  %700 = vmatmul.msk.bf16.vlgmr.msrb.gmra.mxu3 %vm265_vm8, %v461_v0 }
 0x43d   : > { %595 = vmatpush.bf16.msra.mxu3 %v586_v9 }
 0x43e   : > { %v551_v3 = vsel %vm550_vm6, %v743_v55, %v547_v1 }
 0x43f   : > { %v556_v4 = vsel %vm553_vm7, %v555_v2, %v551_v3 }
 0x440   : > { %v557_v5 = vmul.f32 %v739_v41, %v556_v4 }
 0x442   : > { %v558_v6 = vpack.c.bf16 %v557_v5, %v557_v5 }
 0x444   : > { %703 = vmatmul.msk.bf16.vlgmr.msra.gmra.mxu0 %vm265_vm8, %v558_v6  ;;  %vm615_vm8 = vsmask.f32 2304 }
 0x4bf   : > { %v479_v10 = vpop.f32.mrf.mxu3 }
 0x4c0   : > { %v483_v11 = vpack.c.bf16 %v479_v10, %v479_v10 }
 0x4c1   : > { %v576_v12 = vpop.f32.mrf.mxu0 }
 0x4c2   : > { %v580_v13 = vpack.c.bf16 %v576_v12, %v576_v12  ;;  %701 = vmatmul.msk.bf16.vlgmr.msra.gmra.mxu1 %vm217_vm0, %v483_v11 }
 0x4c4   : > { %704 = vmatmul.msk.bf16.vlgmr.msra.gmra.mxu3 %vm217_vm0, %v580_v13  ;;  %vm614_vm0 = vcmask 256000  }
 0x4c5   : > { %vm616_vm9 = vmand %vm614_vm0, %vm615_vm8 }
 0x4c7   : > { %v481_v14 = vpop.f32.mrf.mxu3 }
 0x4c9   : > { %v578_v15 = vpop.f32.mrf.mxu0 }
 0x53f   : > { %v500_v16 = vpop.f32.mrf.mxu1 }
 0x540   : > { %v505_v18 = vadd.f32 %v504_v17, %v500_v16 }
 0x542   : > { %506 = vst.msk [vmem:[#allocation2] sm:$0x1f] %vm311_vm14, %v505_v18 }
 0x547   : > { %v502_v19 = vpop.f32.mrf.mxu1  ;;  %v597_v20 = vpop.f32.mrf.mxu3 }
 0x549   : > { %v601_v21 = vld [vmem:[#allocation2] sm:$0x1f] }
 0x54a   : > { %v602_v22 = vadd.f32 %v601_v21, %v597_v20 }
 0x54c   : > { %603 = vst.msk [vmem:[#allocation2] sm:$0x1f] %vm311_vm14, %v602_v22 }
 0x54f   : > { %v599_v24 = vpop.f32.mrf.mxu3 }
 0x553   : > { %v604_v27 = vld [vmem:[#allocation2] sm:$0x1f] }
 0x554   : > { %v609_v28 = vadd.f32 %v727_v25, %v604_v27 }
 0x556   : > { %v612_v30 = vadd.f32 %v611_v26, %v609_v28 }
 0x558   : > { %v613_v32 = vpack.c.bf16 %v612_v30, %v612_v30 }
 0x55a   : > { %v618_v34 = vsel %vm616_vm9, %v613_v32, %v617_v31 }
 0x55b   : > { %619 = vst [vmem:[%s209_s23] sm:$0x7] %v618_v34 }
 0x55c PF: > { %s14_s15 = sadd.s32 1, %s750_s15  }
 0x55d   : > { %p11_p4 = scmp.ge.s32.totalorder %s14_s15, 4  }
 0x55f   :  { %13 = sbr.rel (!%p11_p4) target bundleno = 1 (0x1), region = 69 }

// kernel: image_encoder_forward.15
= control target key start
LH: loop header
LB: loop body
LE: loop exit
PB: predicated region body
PF: predicated region fallthrough
CT: control target
= control target key end

     0   :  { %vm20_vm0 = vcmask 261120   ;;  %vm24_vm1 = vcmask 254976   ;;  %v98_v6 = vmov 32.0   ;;  %s143_s0 = inlined_call_operand.vmem [shape: bf16[10,32], index: 0, kind: input, shape index: {}]   ;;  %s144_s1 = inlined_call_operand.vmem [shape: f32[1,32], index: 1, kind: input, shape index: {}]   ;;  %s145_s2 = inlined_call_operand.vmem [shape: f32[1,32], index: 2, kind: input, shape index: {}]   ;;  %s146_s3 = inlined_call_operand.vmem [shape: f32[10,32], index: 3, kind: output, shape index: {}]  }
   0x1   :  { %v14_v0 = vld [vmem:[%s143_s0] sm:$0xf]  ;;  %v15_v2 = vld [vmem:[%s143_s0 + $0x4] sm:$0x1]  ;;  %92 = vrcp.f32 %v98_v6 }
   0x2   :  { %v16_v1 = vunpack.c.l.bf16 %v14_v0  ;;  %v17_v4 = vunpack.c.l.bf16 %v15_v2  ;;  %v90_v37 = vld [vmem:[%s144_s1] ss:$0 sm:$0xff] }
   0x3   :  { %v91_v40 = vld [vmem:[%s145_s2] ss:$0 sm:$0xff] }
   0x4   :  { %v21_v3 = vsel %vm20_vm0, %v16_v1, 0.0  ;;  %v25_v5 = vsel %vm24_vm1, %v17_v4, 0.0 }
   0x5   :  { %22 = vadd.xlane.f32.xlu0 %v21_v3 }
   0x7   :  { %v93_v7 = vpop.eup %92 }
   0x8   :  { %v29_v8 = vmul.f32 32.0, %v93_v7  ;;  %vm33_vm2 = vweird.f32 %v93_v7 }
   0xa   :  { %v30_v9 = vsub.f32 1.0, %v29_v8 }
   0xc   :  { %v31_v10 = vmul.f32 %v93_v7, %v30_v9 }
   0xd   :  { %26 = vadd.xlane.f32.xlu0 %v25_v5 }
   0xe   :  { %v32_v11 = vadd.f32 %v93_v7, %v31_v10 }
  0x10   :  { %v34_v12 = vsel %vm33_vm2, %v93_v7, %v32_v11 }
  0x78   :  { %v23_v13 = vpop.xlane.xlu0 %22 }
  0x79   :  { %v35_v14 = vmul.f32 %v34_v12, %v23_v13 }
  0x7b   :  { %v37_v15 = vsub.f32 %v16_v1, %v35_v14 }
  0x7d   :  { %v39_v16 = vmul.f32 %v37_v15, %v37_v15 }
  0x7f   :  { %v41_v17 = vsel %vm20_vm0, %v39_v16, 0.0 }
  0x80   :  { %42 = vadd.xlane.f32.xlu1 %v41_v17  ;;  %v27_v18 = vpop.xlane.xlu0 %26 }
  0x81   :  { %v36_v19 = vmul.f32 %v34_v12, %v27_v18 }
  0x83   :  { %v38_v20 = vsub.f32 %v17_v4, %v36_v19 }
  0x85   :  { %v40_v21 = vmul.f32 %v38_v20, %v38_v20 }
  0x87   :  { %v44_v22 = vsel %vm24_vm1, %v40_v21, 0.0 }
  0x88   :  { %45 = vadd.xlane.f32.xlu1 %v44_v22 }
  0xf3   :  { %v43_v23 = vpop.xlane.xlu1 %42 }
  0xf4   :  { %v47_v24 = vmul.f32 %v43_v23, %v34_v12 }
  0xf6   :  { %v49_v25 = vadd.f32 1e-12, %v47_v24 }
  0xf8   :  { %94 = vrsqrt.f32 %v49_v25  ;;  %vm57_vm4 = vweird.f32 %v49_v25 }
  0xfb   :  { %v46_v26 = vpop.xlane.xlu1 %45 }
  0xfc   :  { %v48_v27 = vmul.f32 %v46_v26, %v34_v12 }
  0xfe   :  { %v95_v28 = vpop.eup %94  ;;  %v50_v29 = vadd.f32 1e-12, %v48_v27 }
  0xff   :  { %v52_v30 = vmul.f32 %v95_v28, %v49_v25  ;;  %vm58_vm3 = vweird.f32 %v95_v28 }
 0x100   :  { %96 = vrsqrt.f32 %v50_v29  ;;  %vm59_vm5 = vmor %vm57_vm4, %vm58_vm3  ;;  %vm67_vm7 = vweird.f32 %v50_v29 }
 0x101   :  { %v53_v31 = vmul.f32 %v95_v28, %v52_v30 }
 0x103   :  { %v54_v32 = vmul.f32 0.5, %v53_v31 }
 0x105   :  { %v55_v33 = vsub.f32 1.5, %v54_v32 }
 0x106   :  { %v97_v34 = vpop.eup %96 }
 0x107   :  { %v56_v35 = vmul.f32 %v95_v28, %v55_v33  ;;  %v62_v36 = vmul.f32 %v97_v34, %v50_v29  ;;  %vm68_vm6 = vweird.f32 %v97_v34 }
 0x108   :  { %vm69_vm8 = vmor %vm67_vm7, %vm68_vm6 }
 0x109   :  { %v60_v38 = vsel %vm59_vm5, %v95_v28, %v56_v35  ;;  %v63_v39 = vmul.f32 %v97_v34, %v62_v36 }
 0x10a   :  { %v71_v41 = vmul.f32 %v60_v38, %v37_v15 }
 0x10b   :  { %v64_v42 = vmul.f32 0.5, %v63_v39 }
 0x10c   :  { %v76_v43 = vmul.f32 %v90_v37, %v71_v41 }
 0x10d   :  { %v65_v44 = vsub.f32 1.5, %v64_v42 }
 0x10e   :  { %v81_v45 = vadd.f32 %v91_v40, %v76_v43 }
 0x10f   :  { %v66_v46 = vmul.f32 %v97_v34, %v65_v44 }
 0x110   :  { %83 = vst.msk [vmem:[%s146_s3] sm:$0xff] %vm20_vm0, %v81_v45 }
 0x111   :  { %v70_v47 = vsel %vm69_vm8, %v97_v34, %v66_v46 }
 0x112   :  { %v72_v48 = vmul.f32 %v70_v47, %v38_v20 }
 0x114   :  { %v77_v49 = vmul.f32 %v90_v37, %v72_v48 }
 0x116   :  { %v82_v50 = vadd.f32 %v91_v40, %v77_v49 }
 0x118   :  { %84 = vst.msk [vmem:[%s146_s3 + $0x8] sm:$0x3] %vm24_vm1, %v82_v50 }

</bundles_post_ra>
